<compile_context>
chip_gen: v6e
topology: v6e:2x2x1
jax: 0.10.0
libtpu: 0.0.40
codegen_flags: <defaults>
</compile_context>

<pallas_src>
import functools
import math

import numpy as np
import jax
import jax.numpy as jnp
from jax.experimental import pallas as pl
from jax.experimental.pallas import tpu as pltpu


# ---------------------------------------------------------------------------
# helpers
# ---------------------------------------------------------------------------

def _vmem_limit():
    """Scoped-VMEM budget derived from the actual chip (v7x: 64 MiB total)."""
    try:
        cap = int(pltpu.get_tpu_info().vmem_capacity_bytes)
        return max(32 * 1024 * 1024, min(3 * cap // 4, 96 * 1024 * 1024))
    except Exception:
        return 32 * 1024 * 1024


def _pick_row_strip(H, W, B, cap_rows=1024):
    """Strip height TR (divisor of H) s.t. TR*W is a multiple of 8 and fits the
    row cap; falls back to the whole image (block == full dim, always legal).
    Keeps >= 2 total grid steps so both v7x TensorCores are used."""
    best = None
    for tr in range(1, H + 1):
        if H % tr:
            continue
        rows = tr * W
        if rows % 8 == 0 and rows <= cap_rows:
            best = tr
    if best is None:
        return H
    if B * (H // best) < 2:
        for tr in range(best - 1, 0, -1):
            if H % tr == 0 and (tr * W) % 8 == 0:
                return tr
    return best


def _pick_lane_tile(n, max_tile=512):
    """Lane tile: full dim, or a multiple-of-128 divisor (BlockSpec rule)."""
    if n <= max_tile:
        return n
    t = (max_tile // 128) * 128
    while t >= 128:
        if n % t == 0:
            return t
        t -= 128
    # TODO(synk): pad N to a multiple of 128 instead of a full-width block.
    return n


def _upsample_matrix(n, scale=2):
    """1-D linear interp matrix matching torch Upsample(bilinear, align_corners=False)."""
    u = np.zeros((scale * n, n), np.float32)
    for o in range(scale * n):
        src = max((o + 0.5) / scale - 0.5, 0.0)
        i0 = min(int(math.floor(src)), n - 1)
        i1 = min(i0 + 1, n - 1)
        frac = src - i0
        u[o, i0] += 1.0 - frac
        u[o, i1] += frac
    return jnp.asarray(u)


# ---------------------------------------------------------------------------
# Kernel A ("front"): reads x once, merged matmuls, writes the p-branch in the
# parity-major shuffled layout + the (folded) pre-upsample b-branch.
# ---------------------------------------------------------------------------

def _front_kernel(x_ref, w1_ref, b1_ref, a1_ref, w2_ref, q_ref, r_ref, *, c):
    cd = w1_ref.dtype
    cq = c // 2

    x = x_ref[0].astype(cd)                                    # fused cast, (rows, C)

    # merged stage-1: [up_p conv (C->2C) | up_b conv (C->C)+bias], PReLU per column
    t = jnp.dot(x, w1_ref[...], preferred_element_type=jnp.float32)
    t = t + b1_ref[...]
    t = jnp.where(t >= 0.0, t, a1_ref[...] * t)

    # merged stage-2: block-diag [PixelShuffle-folded w_p2@Wc_top | w_b2@Wc_bot]
    y = jnp.dot(t.astype(cd), w2_ref[...], preferred_element_type=jnp.float32)

    # y columns: [parity i=0 (2*Cq) | parity i=1 (2*Cq) | b-branch r (Cq)]
    q_ref[0, 0] = y[:, 0 * cq:2 * cq].astype(q_ref.dtype)
    q_ref[0, 1] = y[:, 2 * cq:4 * cq].astype(q_ref.dtype)
    r_ref[0] = y[:, 4 * cq:].astype(r_ref.dtype)
    # TODO(synk): lane-dense stores via an in-kernel (rows, c)->(rows/W, W*c)
    # flatten once Mosaic's general reshape path is verified on all targets.


def _front_pass(x, w1, bias1, alpha1, w2, *, H, W, C, compute_dtype):
    B = x.shape[0]
    Cq = C // 2
    TR = _pick_row_strip(H, W, B)
    S = H // TR
    rows = TR * W

    kern = functools.partial(_front_kernel, c=C)
    q, r = pl.pallas_call(
        kern,
        out_shape=(jax.ShapeDtypeStruct((B, 2, H * W, 2 * Cq), compute_dtype),
                   jax.ShapeDtypeStruct((B, H * W, Cq), compute_dtype)),
        grid=(B, S),
        in_specs=[
            pl.BlockSpec((1, rows, C), lambda b, s: (b, s, 0)),
            pl.BlockSpec((C, 3 * C), lambda b, s: (0, 0)),
            pl.BlockSpec((1, 3 * C), lambda b, s: (0, 0)),
            pl.BlockSpec((1, 3 * C), lambda b, s: (0, 0)),
            pl.BlockSpec((3 * C, 2 * C + Cq), lambda b, s: (0, 0)),
        ],
        out_specs=(pl.BlockSpec((1, 2, rows, 2 * Cq), lambda b, s: (b, 0, s, 0)),
                   pl.BlockSpec((1, rows, Cq), lambda b, s: (b, s, 0))),
        compiler_params=pltpu.CompilerParams(
            dimension_semantics=("parallel", "parallel"),
            vmem_limit_bytes=_vmem_limit()),
    )(x, w1, bias1, alpha1, w2)
    return q, r


# ---------------------------------------------------------------------------
# Kernel B ("combine"): bilinear x2 of the b-branch (W-axis first, shared via
# VMEM scratch across the two row parities) + add the shuffled p-branch.
# Output is row-pair packed (B, H, 2N) == final (B, 2H, 2W, Cq) memory layout.
# ---------------------------------------------------------------------------

def _combine_kernel(q_ref, r_ref, uh_ref, uwc_ref, o_ref, rup_ref):
    i = pl.program_id(2)                      # row parity (innermost, arbitrary)

    @pl.when(i == 0)
    def _():
        # W-axis upsample of this lane tile; reused for both parities.
        rup_ref[...] = jnp.dot(r_ref[0], uwc_ref[...],
                               preferred_element_type=jnp.float32
                               ).astype(rup_ref.dtype)

    # H-axis upsample for this parity (Uh rows 2h+i), then add the p-branch.
    up = jnp.dot(uh_ref[0], rup_ref[...], preferred_element_type=jnp.float32)
    o_ref[0] = (up + q_ref[0, 0].astype(jnp.float32)).astype(o_ref.dtype)


def _combine_pass(q_v, r_v, uh_pack, uwc, *, out_dtype, tn):
    B, _, H, N = q_v.shape
    WCq = r_v.shape[-1]
    J = N // tn

    return pl.pallas_call(
        _combine_kernel,
        out_shape=jax.ShapeDtypeStruct((B, H, 2 * N), out_dtype),
        grid=(B, J, 2),
        in_specs=[
            pl.BlockSpec((1, 1, H, tn), lambda b, j, i: (b, i, 0, j)),
            pl.BlockSpec((1, H, WCq), lambda b, j, i: (b, 0, 0)),
            pl.BlockSpec((1, H, H), lambda b, j, i: (i, 0, 0)),
            pl.BlockSpec((WCq, tn), lambda b, j, i: (0, j)),
        ],
        out_specs=pl.BlockSpec((1, H, tn), lambda b, j, i: (b, 0, i * J + j)),
        scratch_shapes=[pltpu.VMEM((H, tn), uwc.dtype)],
        compiler_params=pltpu.CompilerParams(
            dimension_semantics=("parallel", "parallel", "arbitrary"),
            vmem_limit_bytes=_vmem_limit()),
    )(q_v, r_v, uh_pack, uwc)


# ---------------------------------------------------------------------------
# Parameter setup / weight folding (pure XLA, tiny, once per call)
# ---------------------------------------------------------------------------

def init_params(key, in_channels):
    C = in_channels
    ks = jax.random.split(key, 6)

    def w(k, cin, cout):
        return jax.random.normal(k, (cin, cout), jnp.float32) / np.sqrt(cin)

    return dict(
        w_p1=w(ks[0], C, 2 * C),            # up_p conv1 (no bias)
        w_p2=w(ks[1], C // 2, C // 2),      # up_p conv2 (no bias)
        w_b1=w(ks[2], C, C),                # up_b conv1 (has bias)
        b_b1=jax.random.normal(ks[3], (C,), jnp.float32) * 0.01,
        w_b2=w(ks[4], C, C // 2),           # up_b conv2 (no bias)
        w_conv=w(ks[5], C, C // 2),         # final conv (no bias)
        alpha_p=jnp.asarray(0.25, jnp.float32),   # nn.PReLU() default
        alpha_b=jnp.asarray(0.25, jnp.float32),
    )


def _derive_weights(params, C, compute_dtype):
    Cq = C // 2
    f32 = jnp.float32
    w_p1 = params["w_p1"].astype(f32)
    w_p2 = params["w_p2"].astype(f32)
    w_b1 = params["w_b1"].astype(f32)
    w_b2 = params["w_b2"].astype(f32)
    w_conv = params["w_conv"].astype(f32)

    # Distribute the final conv over the concat:
    #   cat([x_p, x_b]) @ Wc == x_p @ Wc[:Cq] + x_b @ Wc[Cq:]
    w_p_comb = w_p2 @ w_conv[:Cq]            # (Cq, Cq)
    w_b_comb = w_b2 @ w_conv[Cq:]            # (C, Cq)

    # Fold w_p_comb through PixelShuffle(2): block-diagonal over the 4 sub-pixel
    # positions, columns ordered (i, j, c) so the parity split is a column split.
    eye4 = jnp.eye(4, dtype=f32)
    w_fold = (w_p_comb[:, None, None, :] * eye4[None, :, :, None]
              ).reshape(2 * C, 2 * C)

    # merged stage-1 weight / bias / PReLU alpha (per output column)
    w1 = jnp.concatenate([w_p1, w_b1], axis=1)                      # (C, 3C)
    bias1 = jnp.concatenate(
        [jnp.zeros((2 * C,), f32), params["b_b1"].astype(f32)])     # (3C,)
    alpha1 = jnp.concatenate(
        [jnp.broadcast_to(params["alpha_p"].astype(f32), (2 * C,)),
         jnp.broadcast_to(params["alpha_b"].astype(f32), (C,))])    # (3C,)

    # merged stage-2 weight: block-diag [[w_fold, 0], [0, w_b_comb]]
    w2 = jnp.zeros((3 * C, 2 * C + Cq), f32)
    w2 = w2.at[:2 * C, :2 * C].set(w_fold)
    w2 = w2.at[2 * C:, 2 * C:].set(w_b_comb)

    cd = compute_dtype
    return dict(
        w1=w1.astype(cd),
        w2=w2.astype(cd),
        bias1=bias1.reshape(1, 3 * C),
        alpha1=alpha1.reshape(1, 3 * C),
    )


# ---------------------------------------------------------------------------
# Forward
# ---------------------------------------------------------------------------

def upsample_forward(x, params, input_resolution, in_channels, scale_factor=2,
                     compute_dtype=jnp.bfloat16):
    # TODO(synk): scale_factor == 4 path (PixelShuffle(4) variant) not implemented.
    assert scale_factor == 2
    if isinstance(input_resolution, int):
        H = W = input_resolution
    else:
        H, W = input_resolution
    B, L, C = x.shape
    assert L == H * W and C == in_channels and C % 2 == 0
    Cq = C // 2
    N = W * C                     # per-parity output row width (= 2*W*Cq lanes)

    dw = _derive_weights(params, C, compute_dtype)

    # ---- Kernel A: x read once (original dtype), both branch heads ----------
    q_s, r = _front_pass(x, dw["w1"], dw["bias1"], dw["alpha1"], dw["w2"],
                         H=H, W=W, C=C, compute_dtype=compute_dtype)
    # q_s: (B, 2, H*W, 2Cq)  parity-major, already pixel-shuffled per row
    # r  : (B, H*W, Cq)      b-branch contribution, pre bilinear upsample

    # free metadata reshapes (no HBM traffic, no transpose)
    q_v = q_s.reshape(B, 2, H, N)
    r_v = r.reshape(B, H, W * Cq)

    # ---- Kernel B: bilinear x2 + add p-branch, row-pair packed output -------
    U_h = _upsample_matrix(H)                                        # (2H, H)
    uh_pack = jnp.stack([U_h[0::2], U_h[1::2]], axis=0).astype(compute_dtype)
    # kron(Uw, I_Cq)^T keeps the W axis interleaved with channels -> two plain
    # MXU matmuls, no in-kernel transposes.
    # TODO(synk): banded / 2-tap VPU blend for large W (dense kron is O(W^2)).
    uwc = jnp.kron(_upsample_matrix(W),
                   jnp.eye(Cq, dtype=jnp.float32)).T.astype(compute_dtype)

    tn = _pick_lane_tile(N)
    out = _combine_pass(q_v, r_v, uh_pack, uwc, out_dtype=x.dtype, tn=tn)

    # (B, H, 2N) is memory-identical to (B, 2H, 2W, Cq): free reshape.
    return out.reshape(B, 4 * H * W, Cq)


# ---------------------------------------------------------------------------
# Pure-JAX f32 reference (original, unfused op order) for correctness checks
# ---------------------------------------------------------------------------

def pixel_shuffle_nhwc(x, r):
    B, H, W, C = x.shape
    c2 = C // (r * r)
    x = x.reshape(B, H, W, c2, r, r)
    x = x.transpose(0, 1, 4, 2, 5, 3)
    return x.reshape(B, H * r, W * r, c2)


def reference_forward(x, params, H, W):
    B, L, C = x.shape
    xi = x.reshape(B, H, W, C).astype(jnp.float32)
    conv = lambda t, w: jnp.einsum('bhwi,io->bhwo', t, w)
    prelu = lambda t, a: jnp.where(t >= 0, t, a * t)

    p = prelu(conv(xi, params['w_p1']), params['alpha_p'])
    p = pixel_shuffle_nhwc(p, 2)
    x_p = conv(p, params['w_p2'])

    b = prelu(conv(xi, params['w_b1']) + params['b_b1'], params['alpha_b'])
    Uh, Uw = _upsample_matrix(H), _upsample_matrix(W)
    b = jnp.einsum('ph,bhwc->bpwc', Uh, b)
    b = jnp.einsum('qw,bpwc->bpqc', Uw, b)
    x_b = conv(b, params['w_b2'])

    out = conv(jnp.concatenate([x_p, x_b], axis=-1), params['w_conv'])
    return out.reshape(B, -1, C // 2)


if __name__ == "__main__":
    B, H, W, C = 2, 16, 16, 8
    key = jax.random.PRNGKey(0)
    kx, kp = jax.random.split(key)
    x = jax.random.normal(kx, (B, H * W, C), jnp.float32)   # (B, L, C)
    params = init_params(kp, C)

    fwd_f32 = jax.jit(lambda xx, pp: upsample_forward(
        xx, pp, (H, W), C, 2, jnp.float32))
    fwd_bf16 = jax.jit(lambda xx, pp: upsample_forward(
        xx, pp, (H, W), C, 2, jnp.bfloat16))

    ref = np.asarray(reference_forward(x, params, H, W))

    # f32 compute path: tight check of the fusion / folding / layout algebra.
    out_f32 = jax.block_until_ready(fwd_f32(x, params))
    assert out_f32.shape == (B, 4 * H * W, C // 2)
    np.testing.assert_allclose(np.asarray(out_f32), ref, rtol=1e-4, atol=1e-4)

    # bf16 compute path (the fast path): relative-L2 sanity check.
    out_bf16 = jax.block_until_ready(fwd_bf16(x, params))
    assert out_bf16.shape == (B, 4 * H * W, C // 2)
    rel = (np.linalg.norm(np.asarray(out_bf16, np.float32) - ref)
           / np.linalg.norm(ref))
    assert rel < 5e-2, f"bf16 relative error too high: {rel}"

    print("KERNEL_OK")
</pallas_src>

<mosaic_0001>
module attributes {stable_mosaic.version = 11 : i64} {
  func.func @_front_kernel(%arg0: i32, %arg1: i32, %arg2: memref<1x256x8xf32, #tpu.memory_space<vmem>>, %arg3: memref<8x24xf32, #tpu.memory_space<vmem>>, %arg4: memref<1x24xf32, #tpu.memory_space<vmem>>, %arg5: memref<1x24xf32, #tpu.memory_space<vmem>>, %arg6: memref<24x20xf32, #tpu.memory_space<vmem>>, %arg7: memref<1x2x256x8xf32, #tpu.memory_space<vmem>>, %arg8: memref<1x256x4xf32, #tpu.memory_space<vmem>>) attributes {dimension_semantics = [#tpu.dimension_semantics<parallel>, #tpu.dimension_semantics<parallel>], iteration_bounds = array<i64: 2, 1>, scalar_prefetch = 0 : i64, scratch_operands = 0 : i64, tpu.core_type = #tpu.core_type<tc>, window_params = [{transform_indices = @transform_0, window_bounds = array<i64: 1, 256, 8>}, {pipeline_mode = #tpu.pipeline_mode<synchronous>, transform_indices = @transform_1, window_bounds = array<i64: 8, 24>}, {pipeline_mode = #tpu.pipeline_mode<synchronous>, transform_indices = @transform_2, window_bounds = array<i64: 1, 24>}, {pipeline_mode = #tpu.pipeline_mode<synchronous>, transform_indices = @transform_3, window_bounds = array<i64: 1, 24>}, {pipeline_mode = #tpu.pipeline_mode<synchronous>, transform_indices = @transform_4, window_bounds = array<i64: 24, 20>}, {transform_indices = @transform_5, window_bounds = array<i64: 1, 2, 256, 8>}, {transform_indices = @transform_6, window_bounds = array<i64: 1, 256, 4>}]} {
    %c0 = arith.constant 0 : index
    %c0_0 = arith.constant 0 : index
    %c0_1 = arith.constant 0 : index
    %0 = vector.load %arg2[%c0, %c0_0, %c0_1] : memref<1x256x8xf32, #tpu.memory_space<vmem>>, vector<1x256x8xf32>
    %1 = vector.shape_cast %0 : vector<1x256x8xf32> to vector<256x8xf32>
    %c0_2 = arith.constant 0 : index
    %c0_3 = arith.constant 0 : index
    %2 = vector.load %arg3[%c0_2, %c0_3] : memref<8x24xf32, #tpu.memory_space<vmem>>, vector<8x24xf32>
    %cst = arith.constant dense<0.000000e+00> : vector<256x24xf32>
    %3 = tpu.matmul %1, %2, %cst {dimension_numbers = #tpu.dot_dimension_numbers<[1], [0], [0], [1], [0, 0, 1, 1], [], []>} : vector<256x8xf32>, vector<8x24xf32>, vector<256x24xf32> -> vector<256x24xf32>
    %c0_4 = arith.constant 0 : index
    %c0_5 = arith.constant 0 : index
    %4 = vector.load %arg4[%c0_4, %c0_5] : memref<1x24xf32, #tpu.memory_space<vmem>>, vector<1x24xf32>
    %5 = vector.broadcast %4 : vector<1x24xf32> to vector<256x24xf32>
    %6 = arith.addf %3, %5 : vector<256x24xf32>
    %cst_6 = arith.constant 0.000000e+00 : f32
    %7 = vector.broadcast %cst_6 : f32 to vector<256x24xf32>
    %8 = arith.cmpf oge, %6, %7 : vector<256x24xf32>
    %c0_7 = arith.constant 0 : index
    %c0_8 = arith.constant 0 : index
    %9 = vector.load %arg5[%c0_7, %c0_8] : memref<1x24xf32, #tpu.memory_space<vmem>>, vector<1x24xf32>
    %10 = vector.broadcast %9 : vector<1x24xf32> to vector<256x24xf32>
    %11 = arith.mulf %10, %6 : vector<256x24xf32>
    %12 = arith.select %8, %6, %11 : vector<256x24xi1>, vector<256x24xf32>
    %c0_9 = arith.constant 0 : index
    %c0_10 = arith.constant 0 : index
    %13 = vector.load %arg6[%c0_9, %c0_10] : memref<24x20xf32, #tpu.memory_space<vmem>>, vector<24x20xf32>
    %cst_11 = arith.constant dense<0.000000e+00> : vector<256x20xf32>
    %14 = tpu.matmul %12, %13, %cst_11 {dimension_numbers = #tpu.dot_dimension_numbers<[1], [0], [0], [1], [0, 0, 1, 1], [], []>} : vector<256x24xf32>, vector<24x20xf32>, vector<256x20xf32> -> vector<256x20xf32>
    %15 = vector.extract_strided_slice %14 {offsets = [0, 0], sizes = [256, 8], strides = [1, 1]} : vector<256x20xf32> to vector<256x8xf32>
    %c0_12 = arith.constant 0 : index
    %c0_13 = arith.constant 0 : index
    %c0_14 = arith.constant 0 : index
    %c0_15 = arith.constant 0 : index
    %16 = vector.load %arg7[%c0_12, %c0_13, %c0_14, %c0_15] : memref<1x2x256x8xf32, #tpu.memory_space<vmem>>, vector<1x1x256x8xf32>
    %17 = vector.shape_cast %16 : vector<1x1x256x8xf32> to vector<256x8xf32>
    %18 = vector.shape_cast %15 : vector<256x8xf32> to vector<1x1x256x8xf32>
    tpu.vector_store %arg7[%c0_12, %c0_13, %c0_14, %c0_15], %18 {strides = array<i32>} : memref<1x2x256x8xf32, #tpu.memory_space<vmem>>, vector<1x1x256x8xf32>,
    %19 = vector.extract_strided_slice %14 {offsets = [0, 8], sizes = [256, 8], strides = [1, 1]} : vector<256x20xf32> to vector<256x8xf32>
    %c0_16 = arith.constant 0 : index
    %c1 = arith.constant 1 : index
    %c0_17 = arith.constant 0 : index
    %c0_18 = arith.constant 0 : index
    %20 = vector.load %arg7[%c0_16, %c1, %c0_17, %c0_18] : memref<1x2x256x8xf32, #tpu.memory_space<vmem>>, vector<1x1x256x8xf32>
    %21 = vector.shape_cast %20 : vector<1x1x256x8xf32> to vector<256x8xf32>
    %22 = vector.shape_cast %19 : vector<256x8xf32> to vector<1x1x256x8xf32>
    tpu.vector_store %arg7[%c0_16, %c1, %c0_17, %c0_18], %22 {strides = array<i32>} : memref<1x2x256x8xf32, #tpu.memory_space<vmem>>, vector<1x1x256x8xf32>,
    %23 = vector.extract_strided_slice %14 {offsets = [0, 16], sizes = [256, 4], strides = [1, 1]} : vector<256x20xf32> to vector<256x4xf32>
    %c0_19 = arith.constant 0 : index
    %c0_20 = arith.constant 0 : index
    %c0_21 = arith.constant 0 : index
    %24 = vector.load %arg8[%c0_19, %c0_20, %c0_21] : memref<1x256x4xf32, #tpu.memory_space<vmem>>, vector<1x256x4xf32>
    %25 = vector.shape_cast %24 : vector<1x256x4xf32> to vector<256x4xf32>
    %26 = vector.shape_cast %23 : vector<256x4xf32> to vector<1x256x4xf32>
    tpu.vector_store %arg8[%c0_19, %c0_20, %c0_21], %26 {strides = array<i32>} : memref<1x256x4xf32, #tpu.memory_space<vmem>>, vector<1x256x4xf32>,
    return
  }
  func.func @transform_0(%arg0: i32, %arg1: i32) -> (i32, i32, i32) {
    %c0_i32 = arith.constant 0 : i32
    %c0_i32_0 = arith.constant 0 : i32
    return %arg0, %arg1, %c0_i32 : i32, i32, i32
  }
  func.func @transform_1(%arg0: i32, %arg1: i32) -> (i32, i32) {
    %c0_i32 = arith.constant 0 : i32
    %c0_i32_0 = arith.constant 0 : i32
    %c0_i32_1 = arith.constant 0 : i32
    return %c0_i32, %c0_i32_0 : i32, i32
  }
  func.func @transform_2(%arg0: i32, %arg1: i32) -> (i32, i32) {
    %c0_i32 = arith.constant 0 : i32
    %c0_i32_0 = arith.constant 0 : i32
    %c0_i32_1 = arith.constant 0 : i32
    return %c0_i32, %c0_i32_0 : i32, i32
  }
  func.func @transform_3(%arg0: i32, %arg1: i32) -> (i32, i32) {
    %c0_i32 = arith.constant 0 : i32
    %c0_i32_0 = arith.constant 0 : i32
    %c0_i32_1 = arith.constant 0 : i32
    return %c0_i32, %c0_i32_0 : i32, i32
  }
  func.func @transform_4(%arg0: i32, %arg1: i32) -> (i32, i32) {
    %c0_i32 = arith.constant 0 : i32
    %c0_i32_0 = arith.constant 0 : i32
    %c0_i32_1 = arith.constant 0 : i32
    return %c0_i32, %c0_i32_0 : i32, i32
  }
  func.func @transform_5(%arg0: i32, %arg1: i32) -> (i32, i32, i32, i32) {
    %c0_i32 = arith.constant 0 : i32
    %c0_i32_0 = arith.constant 0 : i32
    %c0_i32_1 = arith.constant 0 : i32
    return %arg0, %c0_i32, %arg1, %c0_i32_0 : i32, i32, i32, i32
  }
  func.func @transform_6(%arg0: i32, %arg1: i32) -> (i32, i32, i32) {
    %c0_i32 = arith.constant 0 : i32
    %c0_i32_0 = arith.constant 0 : i32
    return %arg0, %arg1, %c0_i32 : i32, i32, i32
  }
}

module attributes {stable_mosaic.version = 11 : i64} {
  func.func @_combine_kernel(%arg0: i32, %arg1: i32, %arg2: i32, %arg3: memref<1x1x16x128xf32, #tpu.memory_space<vmem>>, %arg4: memref<1x16x64xf32, #tpu.memory_space<vmem>>, %arg5: memref<1x16x16xf32, #tpu.memory_space<vmem>>, %arg6: memref<64x128xf32, #tpu.memory_space<vmem>>, %arg7: memref<1x16x128xf32, #tpu.memory_space<vmem>>, %arg8: memref<16x128xf32, #tpu.memory_space<vmem>>) attributes {dimension_semantics = [#tpu.dimension_semantics<parallel>, #tpu.dimension_semantics<parallel>, #tpu.dimension_semantics<arbitrary>], iteration_bounds = array<i64: 2, 1, 2>, scalar_prefetch = 0 : i64, scratch_operands = 1 : i64, tpu.core_type = #tpu.core_type<tc>, window_params = [{transform_indices = @transform_0, window_bounds = array<i64: 1, 1, 16, 128>}, {transform_indices = @transform_1, window_bounds = array<i64: 1, 16, 64>}, {transform_indices = @transform_2, window_bounds = array<i64: 1, 16, 16>}, {transform_indices = @transform_3, window_bounds = array<i64: 64, 128>}, {transform_indices = @transform_4, window_bounds = array<i64: 1, 16, 128>}]} {
    %c0_i32 = arith.constant 0 : i32
    %0 = arith.cmpi eq, %arg2, %c0_i32 : i32
    %1 = arith.extui %0 : i1 to i32
    %c0_i32_0 = arith.constant 0 : i32
    %2 = arith.cmpi ne, %1, %c0_i32_0 : i32
    scf.if %2 {
      %c0_12 = arith.constant 0 : index
      %c0_13 = arith.constant 0 : index
      %c0_14 = arith.constant 0 : index
      %13 = vector.load %arg4[%c0_12, %c0_13, %c0_14] : memref<1x16x64xf32, #tpu.memory_space<vmem>>, vector<1x16x64xf32>
      %14 = vector.shape_cast %13 : vector<1x16x64xf32> to vector<16x64xf32>
      %c0_15 = arith.constant 0 : index
      %c0_16 = arith.constant 0 : index
      %15 = vector.load %arg6[%c0_15, %c0_16] : memref<64x128xf32, #tpu.memory_space<vmem>>, vector<64x128xf32>
      %cst_17 = arith.constant dense<0.000000e+00> : vector<16x128xf32>
      %16 = tpu.matmul %14, %15, %cst_17 {dimension_numbers = #tpu.dot_dimension_numbers<[1], [0], [0], [1], [0, 0, 1, 1], [], []>} : vector<16x64xf32>, vector<64x128xf32>, vector<16x128xf32> -> vector<16x128xf32>
      %c0_18 = arith.constant 0 : index
      %c0_19 = arith.constant 0 : index
      %17 = vector.load %arg8[%c0_18, %c0_19] : memref<16x128xf32, #tpu.memory_space<vmem>>, vector<16x128xf32>
      tpu.vector_store %arg8[%c0_18, %c0_19], %16 {strides = array<i32>} : memref<16x128xf32, #tpu.memory_space<vmem>>, vector<16x128xf32>,
    } else {
    }
    %c0 = arith.constant 0 : index
    %c0_1 = arith.constant 0 : index
    %c0_2 = arith.constant 0 : index
    %3 = vector.load %arg5[%c0, %c0_1, %c0_2] : memref<1x16x16xf32, #tpu.memory_space<vmem>>, vector<1x16x16xf32>
    %4 = vector.shape_cast %3 : vector<1x16x16xf32> to vector<16x16xf32>
    %c0_3 = arith.constant 0 : index
    %c0_4 = arith.constant 0 : index
    %5 = vector.load %arg8[%c0_3, %c0_4] : memref<16x128xf32, #tpu.memory_space<vmem>>, vector<16x128xf32>
    %cst = arith.constant dense<0.000000e+00> : vector<16x128xf32>
    %6 = tpu.matmul %4, %5, %cst {dimension_numbers = #tpu.dot_dimension_numbers<[1], [0], [0], [1], [0, 0, 1, 1], [], []>} : vector<16x16xf32>, vector<16x128xf32>, vector<16x128xf32> -> vector<16x128xf32>
    %c0_5 = arith.constant 0 : index
    %c0_6 = arith.constant 0 : index
    %c0_7 = arith.constant 0 : index
    %c0_8 = arith.constant 0 : index
    %7 = vector.load %arg3[%c0_5, %c0_6, %c0_7, %c0_8] : memref<1x1x16x128xf32, #tpu.memory_space<vmem>>, vector<1x1x16x128xf32>
    %8 = vector.shape_cast %7 : vector<1x1x16x128xf32> to vector<16x128xf32>
    %9 = arith.addf %6, %8 : vector<16x128xf32>
    %c0_9 = arith.constant 0 : index
    %c0_10 = arith.constant 0 : index
    %c0_11 = arith.constant 0 : index
    %10 = vector.load %arg7[%c0_9, %c0_10, %c0_11] : memref<1x16x128xf32, #tpu.memory_space<vmem>>, vector<1x16x128xf32>
    %11 = vector.shape_cast %10 : vector<1x16x128xf32> to vector<16x128xf32>
    %12 = vector.shape_cast %9 : vector<16x128xf32> to vector<1x16x128xf32>
    tpu.vector_store %arg7[%c0_9, %c0_10, %c0_11], %12 {strides = array<i32>} : memref<1x16x128xf32, #tpu.memory_space<vmem>>, vector<1x16x128xf32>,
    return
  }
  func.func @transform_0(%arg0: i32, %arg1: i32, %arg2: i32) -> (i32, i32, i32, i32) {
    %c0_i32 = arith.constant 0 : i32
    %c0_i32_0 = arith.constant 0 : i32
    return %arg0, %arg2, %c0_i32, %arg1 : i32, i32, i32, i32
  }
  func.func @transform_1(%arg0: i32, %arg1: i32, %arg2: i32) -> (i32, i32, i32) {
    %c0_i32 = arith.constant 0 : i32
    %c0_i32_0 = arith.constant 0 : i32
    %c0_i32_1 = arith.constant 0 : i32
    return %arg0, %c0_i32, %c0_i32_0 : i32, i32, i32
  }
  func.func @transform_2(%arg0: i32, %arg1: i32, %arg2: i32) -> (i32, i32, i32) {
    %c0_i32 = arith.constant 0 : i32
    %c0_i32_0 = arith.constant 0 : i32
    %c0_i32_1 = arith.constant 0 : i32
    return %arg2, %c0_i32, %c0_i32_0 : i32, i32, i32
  }
  func.func @transform_3(%arg0: i32, %arg1: i32, %arg2: i32) -> (i32, i32) {
    %c0_i32 = arith.constant 0 : i32
    %c0_i32_0 = arith.constant 0 : i32
    return %c0_i32, %arg1 : i32, i32
  }
  func.func @transform_4(%arg0: i32, %arg1: i32, %arg2: i32) -> (i32, i32, i32) {
    %c1_i32 = arith.constant 1 : i32
    %0 = arith.muli %arg2, %c1_i32 : i32
    %1 = arith.addi %0, %arg1 : i32
    %c0_i32 = arith.constant 0 : i32
    %c0_i32_0 = arith.constant 0 : i32
    return %arg0, %c0_i32, %1 : i32, i32, i32
  }
}

</mosaic_0001>

<bundles_post_ra>
// kernel: _lambda_.2
= control target key start
LH: loop header
LB: loop body
LE: loop exit
PB: predicated region body
PF: predicated region fallthrough
CT: control target
= control target key end

     0   :  { %s1937_s21 = smov 0   ;;  %s1939_s22 = smov 0   ;;  %s2425_s0 = inlined_call_operand.vmem [shape: f32[2,256,8], index: 0, kind: input, shape index: {}]   ;;  %s2426_s1 = inlined_call_operand.vmem [shape: f32[8,24], index: 1, kind: input, shape index: {}]   ;;  %s2427_s2 = inlined_call_operand.vmem [shape: f32[1,24], index: 2, kind: input, shape index: {}]   ;;  %s2428_s3 = inlined_call_operand.vmem [shape: f32[1,24], index: 3, kind: input, shape index: {}]   ;;  %s2429_s4 = inlined_call_operand.vmem [shape: f32[24,20], index: 4, kind: input, shape index: {}]   ;;  %s2430_s5 = inlined_call_operand.vmem [shape: f32[2,2,256,8], index: 5, kind: output, shape index: {0}]   ;;  %s2431_s6 = inlined_call_operand.vmem [shape: f32[2,256,4], index: 6, kind: output, shape index: {1}]  }
   0x1   :  { %s1941_s23 = smov 0  }
   0x2 LB: > { %s29_s24 = sadd.s32 1, %s1894_s22  ;;  %p1568_p0 = scmp.ge.s32.totalorder %s1898_s23, 1  ;;  %s1898_s23 = sphi %s1941_s23, %s17_s23   ;;  %s1894_s22 = sphi %s1939_s22, %s2433_s22   ;;  %s1890_s21 = sphi %s1937_s21, %s2432_s21  }
   0x3   : > { %p31_p1 = scmp.ge.s32.totalorder %s29_s24, 2  ;;  %p238_p2 = scmp.lt.s32.totalorder %s1898_s23, 3 }
   0x5   : > { %s2435_s24 = smov (%p31_p1, %s29_s24), 0  ;;  %p239_p3 = pnand %p1568_p0, %p238_p2 }
   0x6   : > { %p286_p4 = scmp.lt.s32.totalorder (!%p239_p3), %s1890_s21, 1  ;;  %s1900_s25 = smov (!%p239_p3), 112  }
   0x7   : > { %242 = sbr.rel (%p239_p3) target bundleno = 651 (0x28b), region = 40  ;;  %s1901_s26 = smov (!%p239_p3), 120  }
   0xc   : > { %v347_v0 = vld [vmem:[%s2426_s1] sm:$0xff]  ;;  %s2437_s21 = smov (!%p286_p4, %s1890_s21), 1  ;;  %vm355_vm0 = vcmask 64512   ;;  %v782_v33 = vld [vmem:[%s2429_s4 + $0x10] sm:$0xff]  ;;  %v781_v34 = vld [vmem:[%s2429_s4 + $0x8] sm:$0xff]  ;;  %vm783_vm1 = vcmask 195584  }
   0xd   : > { %1746 = vmatprep.subr.mxu0 %v347_v0  ;;  %s1675_s27 = sshll.u32 %s2437_s21, 8  ;;  %1796 = vmatprep.subr.mxu1 %v782_v33  ;;  %v780_v35 = vld [vmem:[%s2429_s4] sm:$0xff]  ;;  %s1676_s17 = sshll.u32 %s2437_s21, 9 }
   0xe   : > { %1747 = vmatpush3.msra.mxu0 %v347_v0  ;;  %s1966_s30 = scalar_lea.vmem %s2425_s0, %s1675_s27  ;;  %1797 = vmatpush3.msra.mxu1 %v782_v33  ;;  %v2044_v36 = vld [vmem:[%s2427_s2] ss:$0 sm:$0xff]  ;;  %s2151_s20 = scalar_lea.vmem %s2430_s5, %s1676_s17 }
   0xf   : > { %v315_v1 = vld [vmem:[%s1966_s30] sm:$0xff]  ;;  %v316_v2 = vld [vmem:[%s1966_s30 + $0x8] sm:$0xff]  ;;  %v317_v3 = vld [vmem:[%s1966_s30 + $0x10] sm:$0xff]  ;;  %1798 = vmatprep.subr.mxu1 %v781_v34 }
  0x10   : > { %1748 = vmatprep.mubr.msk.f32.mxu0 %vm355_vm0, %v315_v1  ;;  %v318_v4 = vld [vmem:[%s1966_s30 + $0x18] sm:$0xff]  ;;  %v319_v5 = vld [vmem:[%s1966_s30 + $0x20] sm:$0xff]  ;;  %v320_v6 = vld [vmem:[%s1966_s30 + $0x28] sm:$0xff]  ;;  %1799 = vmatpush3.msra.mxu1 %v781_v34 }
  0x11   : > { %1749 = vmatmul.mubr.msk.f32.vlgmr.msra.gmra.mxu0 %vm355_vm0, %v316_v2  ;;  %v321_v7 = vld [vmem:[%s1966_s30 + $0x30] sm:$0xff]  ;;  %v322_v8 = vld [vmem:[%s1966_s30 + $0x38] sm:$0xff]  ;;  %v323_v9 = vld [vmem:[%s1966_s30 + $0x40] sm:$0xff]  ;;  %1800 = vmatprep.subr.mxu1 %v780_v35 }
  0x12   : > { %1751 = vmatprep.mubr.msk.f32.mxu0 %vm355_vm0, %v317_v3  ;;  %v324_v10 = vld [vmem:[%s1966_s30 + $0x48] sm:$0xff]  ;;  %v325_v11 = vld [vmem:[%s1966_s30 + $0x50] sm:$0xff]  ;;  %v326_v12 = vld [vmem:[%s1966_s30 + $0x58] sm:$0xff]  ;;  %1801 = vmatpush3.msra.mxu1 %v780_v35 }
  0x13   : > { %v327_v13 = vld [vmem:[%s1966_s30 + $0x60] sm:$0xff]  ;;  %v328_v14 = vld [vmem:[%s1966_s30 + $0x68] sm:$0xff]  ;;  %v329_v15 = vld [vmem:[%s1966_s30 + $0x70] sm:$0xff] }
  0x14   : > { %v330_v16 = vld [vmem:[%s1966_s30 + $0x78] sm:$0xff]  ;;  %v331_v17 = vld [vmem:[%s1966_s30 + $0x80] sm:$0xff]  ;;  %v332_v18 = vld [vmem:[%s1966_s30 + $0x88] sm:$0xff] }
  0x15   : > { %1752 = vmatmul.mubr.msk.f32.gmra.mxu0 %vm355_vm0, %v318_v4  ;;  %v333_v19 = vld [vmem:[%s1966_s30 + $0x90] sm:$0xff]  ;;  %v334_v20 = vld [vmem:[%s1966_s30 + $0x98] sm:$0xff]  ;;  %v335_v21 = vld [vmem:[%s1966_s30 + $0xa0] sm:$0xff] }
  0x16   : > { %1754 = vmatprep.mubr.msk.f32.mxu0 %vm355_vm0, %v319_v5  ;;  %v336_v22 = vld [vmem:[%s1966_s30 + $0xa8] sm:$0xff]  ;;  %v337_v23 = vld [vmem:[%s1966_s30 + $0xb0] sm:$0xff]  ;;  %v338_v24 = vld [vmem:[%s1966_s30 + $0xb8] sm:$0xff] }
  0x17   : > { %v339_v25 = vld [vmem:[%s1966_s30 + $0xc0] sm:$0xff]  ;;  %v340_v26 = vld [vmem:[%s1966_s30 + $0xc8] sm:$0xff]  ;;  %v341_v27 = vld [vmem:[%s1966_s30 + $0xd0] sm:$0xff] }
  0x18   : > { %v342_v28 = vld [vmem:[%s1966_s30 + $0xd8] sm:$0xff]  ;;  %v343_v29 = vld [vmem:[%s1966_s30 + $0xe0] sm:$0xff]  ;;  %v344_v30 = vld [vmem:[%s1966_s30 + $0xe8] sm:$0xff] }
  0x19   : > { %1755 = vmatmul.mubr.msk.f32.gmra.mxu0 %vm355_vm0, %v320_v6  ;;  %v345_v31 = vld [vmem:[%s1966_s30 + $0xf0] sm:$0xff]  ;;  %v346_v32 = vld [vmem:[%s1966_s30 + $0xf8] sm:$0xff]  ;;  %v2050_v39 = vld [vmem:[%s2428_s3] ss:$0 sm:$0xff]  ;;  %s2280_s30 = scalar_lea.vmem %s2431_s6, %s1675_s27 }
  0x1a   : > { %1757 = vmatprep.mubr.msk.f32.mxu0 %vm355_vm0, %v321_v7 }
  0x1d   : > { %1758 = vmatmul.mubr.msk.f32.gmra.mxu0 %vm355_vm0, %v322_v8 }
  0x1e   : > { %1760 = vmatprep.mubr.msk.f32.mxu0 %vm355_vm0, %v323_v9 }
  0x21   : > { %1761 = vmatmul.mubr.msk.f32.gmra.mxu0 %vm355_vm0, %v324_v10 }
  0x22   : > { %1763 = vmatprep.mubr.msk.f32.mxu0 %vm355_vm0, %v325_v11 }
  0x25   : > { %1764 = vmatmul.mubr.msk.f32.gmra.mxu0 %vm355_vm0, %v326_v12 }
  0x26   : > { %1766 = vmatprep.mubr.msk.f32.mxu0 %vm355_vm0, %v327_v13 }
  0x29   : > { %1767 = vmatmul.mubr.msk.f32.gmra.mxu0 %vm355_vm0, %v328_v14 }
  0x2a   : > { %1769 = vmatprep.mubr.msk.f32.mxu0 %vm355_vm0, %v329_v15 }
  0x2d   : > { %1770 = vmatmul.mubr.msk.f32.gmra.mxu0 %vm355_vm0, %v330_v16 }
  0x2e   : > { %1772 = vmatprep.mubr.msk.f32.mxu0 %vm355_vm0, %v331_v17 }
  0x31   : > { %1773 = vmatmul.mubr.msk.f32.gmra.mxu0 %vm355_vm0, %v332_v18 }
  0x32   : > { %1775 = vmatprep.mubr.msk.f32.mxu0 %vm355_vm0, %v333_v19 }
  0x35   : > { %1776 = vmatmul.mubr.msk.f32.gmra.mxu0 %vm355_vm0, %v334_v20 }
  0x36   : > { %1778 = vmatprep.mubr.msk.f32.mxu0 %vm355_vm0, %v335_v21 }
  0x39   : > { %1779 = vmatmul.mubr.msk.f32.gmra.mxu0 %vm355_vm0, %v336_v22 }
  0x3a   : > { %1781 = vmatprep.mubr.msk.f32.mxu0 %vm355_vm0, %v337_v23 }
  0x3d   : > { %1782 = vmatmul.mubr.msk.f32.gmra.mxu0 %vm355_vm0, %v338_v24 }
  0x3e   : > { %1784 = vmatprep.mubr.msk.f32.mxu0 %vm355_vm0, %v339_v25 }
  0x41   : > { %1785 = vmatmul.mubr.msk.f32.gmra.mxu0 %vm355_vm0, %v340_v26 }
  0x42   : > { %1787 = vmatprep.mubr.msk.f32.mxu0 %vm355_vm0, %v341_v27 }
  0x45   : > { %1788 = vmatmul.mubr.msk.f32.gmra.mxu0 %vm355_vm0, %v342_v28 }
  0x46   : > { %1790 = vmatprep.mubr.msk.f32.mxu0 %vm355_vm0, %v343_v29 }
  0x49   : > { %1791 = vmatmul.mubr.msk.f32.gmra.mxu0 %vm355_vm0, %v344_v30 }
  0x4a   : > { %1793 = vmatprep.mubr.msk.f32.mxu0 %vm355_vm0, %v345_v31 }
  0x4d   : > { %1794 = vmatmul.mubr.msk.f32.gmra.mxu0 %vm355_vm0, %v346_v32 }
  0xd1   : > { %v1750_v37 = vpop.f32.mrf.mxu0 }
  0xd2   : > { %v524_v38 = vadd.f32 %v1750_v37, %v2044_v36 }
  0xd3   : > { %v518_v40 = vpop.f32.mrf.mxu0 }
  0xd4   : > { %v519_v41 = vadd.f32 %v2044_v36, %v518_v40  ;;  %v717_v42 = vmul.f32 %v2050_v39, %v524_v38  ;;  %vm678_vm2 = vcmp.ge.f32.partialorder %v524_v38, 0.0 }
  0xd5   : > { %v1753_v43 = vpop.f32.mrf.mxu0 }
  0xd6   : > { %v534_v44 = vadd.f32 %v1753_v43, %v2044_v36  ;;  %vm677_vm3 = vcmp.ge.f32.partialorder %v519_v41, 0.0  ;;  %v716_v45 = vmul.f32 %v2050_v39, %v519_v41  ;;  %v749_v51 = vsel %vm678_vm2, %v524_v38, %v717_v42 }
  0xd7   : > { %v528_v46 = vpop.f32.mrf.mxu0 }
  0xd8   : > { %v529_v47 = vadd.f32 %v2044_v36, %v528_v46  ;;  %v748_v48 = vsel %vm677_vm3, %v519_v41, %v716_v45  ;;  %v719_v49 = vmul.f32 %v2050_v39, %v534_v44  ;;  %vm680_vm4 = vcmp.ge.f32.partialorder %v534_v44, 0.0 }
  0xd9   : > { %v1756_v50 = vpop.f32.mrf.mxu0  ;;  %1802 = vmatprep.mubr.msk.f32.mxu1 %vm783_vm1, %v748_v48 }
  0xda   : > { %vm679_vm5 = vcmp.ge.f32.partialorder %v529_v47, 0.0  ;;  %v718_v52 = vmul.f32 %v2050_v39, %v529_v47  ;;  %v544_v53 = vadd.f32 %v1756_v50, %v2044_v36  ;;  %1803 = vmatmul.mubr.msk.f32.vlgmr.msra.gmra.mxu1 %vm783_vm1, %v749_v51  ;;  %v751_v58 = vsel %vm680_vm4, %v534_v44, %v719_v49 }
  0xdb   : > { %v538_v54 = vpop.f32.mrf.mxu0 }
  0xdc   : > { %vm682_vm6 = vcmp.ge.f32.partialorder %v544_v53, 0.0  ;;  %v721_v55 = vmul.f32 %v2050_v39, %v544_v53  ;;  %v539_v56 = vadd.f32 %v2044_v36, %v538_v54  ;;  %v750_v57 = vsel %vm679_vm5, %v529_v47, %v718_v52 }
  0xdd   : > { %1805 = vmatprep.mubr.msk.f32.mxu1 %vm783_vm1, %v750_v57  ;;  %v1759_v59 = vpop.f32.mrf.mxu0 }
  0xde   : > { %vm681_vm7 = vcmp.ge.f32.partialorder %v539_v56, 0.0  ;;  %v720_v60 = vmul.f32 %v2050_v39, %v539_v56  ;;  %1806 = vmatmul.mubr.msk.f32.gmra.mxu1 %vm783_vm1, %v751_v58  ;;  %v554_v61 = vadd.f32 %v1759_v59, %v2044_v36  ;;  %v753_v63 = vsel %vm682_vm6, %v544_v53, %v721_v55 }
  0xdf   : > { %v548_v62 = vpop.f32.mrf.mxu0 }
  0xe0   : > { %vm684_vm8 = vcmp.ge.f32.partialorder %v554_v61, 0.0  ;;  %v723_v0 = vmul.f32 %v2050_v39, %v554_v61  ;;  %v752_v1 = vsel %vm681_vm7, %v539_v56, %v720_v60  ;;  %v549_v2 = vadd.f32 %v2044_v36, %v548_v62 }
  0xe1   : > { %1808 = vmatprep.mubr.msk.f32.mxu1 %vm783_vm1, %v752_v1  ;;  %v1762_v3 = vpop.f32.mrf.mxu0 }
  0xe2   : > { %vm683_vm9 = vcmp.ge.f32.partialorder %v549_v2, 0.0  ;;  %v722_v4 = vmul.f32 %v2050_v39, %v549_v2  ;;  %1809 = vmatmul.mubr.msk.f32.gmra.mxu1 %vm783_vm1, %v753_v63  ;;  %v564_v5 = vadd.f32 %v1762_v3, %v2044_v36  ;;  %v755_v6 = vsel %vm684_vm8, %v554_v61, %v723_v0 }
  0xe3   : > { %v558_v7 = vpop.f32.mrf.mxu0 }
  0xe4   : > { %vm686_vm10 = vcmp.ge.f32.partialorder %v564_v5, 0.0  ;;  %v725_v8 = vmul.f32 %v2050_v39, %v564_v5  ;;  %v754_v9 = vsel %vm683_vm9, %v549_v2, %v722_v4  ;;  %v559_v10 = vadd.f32 %v2044_v36, %v558_v7 }
  0xe5   : > { %1811 = vmatprep.mubr.msk.f32.mxu1 %vm783_vm1, %v754_v9  ;;  %v1765_v11 = vpop.f32.mrf.mxu0 }
  0xe6   : > { %1812 = vmatmul.mubr.msk.f32.gmra.mxu1 %vm783_vm1, %v755_v6  ;;  %vm685_vm11 = vcmp.ge.f32.partialorder %v559_v10, 0.0  ;;  %v724_v12 = vmul.f32 %v2050_v39, %v559_v10  ;;  %v574_v13 = vadd.f32 %v1765_v11, %v2044_v36  ;;  %v757_v14 = vsel %vm686_vm10, %v564_v5, %v725_v8 }
  0xe7   : > { %v568_v15 = vpop.f32.mrf.mxu0 }
  0xe8   : > { %vm688_vm12 = vcmp.ge.f32.partialorder %v574_v13, 0.0  ;;  %v727_v16 = vmul.f32 %v2050_v39, %v574_v13  ;;  %v756_v17 = vsel %vm685_vm11, %v559_v10, %v724_v12  ;;  %v569_v18 = vadd.f32 %v2044_v36, %v568_v15 }
  0xe9   : > { %1814 = vmatprep.mubr.msk.f32.mxu1 %vm783_vm1, %v756_v17  ;;  %v1768_v19 = vpop.f32.mrf.mxu0 }
  0xea   : > { %1815 = vmatmul.mubr.msk.f32.gmra.mxu1 %vm783_vm1, %v757_v14  ;;  %vm687_vm13 = vcmp.ge.f32.partialorder %v569_v18, 0.0  ;;  %v726_v20 = vmul.f32 %v2050_v39, %v569_v18  ;;  %v584_v21 = vadd.f32 %v1768_v19, %v2044_v36  ;;  %v759_v22 = vsel %vm688_vm12, %v574_v13, %v727_v16 }
  0xeb   : > { %v578_v23 = vpop.f32.mrf.mxu0 }
  0xec   : > { %vm690_vm14 = vcmp.ge.f32.partialorder %v584_v21, 0.0  ;;  %v729_v24 = vmul.f32 %v2050_v39, %v584_v21  ;;  %v758_v25 = vsel %vm687_vm13, %v569_v18, %v726_v20  ;;  %v579_v26 = vadd.f32 %v2044_v36, %v578_v23 }
  0xed   : > { %1817 = vmatprep.mubr.msk.f32.mxu1 %vm783_vm1, %v758_v25  ;;  %v1771_v27 = vpop.f32.mrf.mxu0 }
  0xee   : > { %1818 = vmatmul.mubr.msk.f32.gmra.mxu1 %vm783_vm1, %v759_v22  ;;  %vm689_vm15 = vcmp.ge.f32.partialorder %v579_v26, 0.0  ;;  %v728_v28 = vmul.f32 %v2050_v39, %v579_v26  ;;  %v594_v29 = vadd.f32 %v1771_v27, %v2044_v36  ;;  %v761_v30 = vsel %vm690_vm14, %v584_v21, %v729_v24 }
  0xef   : > { %v588_v31 = vpop.f32.mrf.mxu0 }
  0xf0   : > { %vm692_vm2 = vcmp.ge.f32.partialorder %v594_v29, 0.0  ;;  %v731_v32 = vmul.f32 %v2050_v39, %v594_v29  ;;  %v760_v33 = vsel %vm689_vm15, %v579_v26, %v728_v28  ;;  %v589_v34 = vadd.f32 %v2044_v36, %v588_v31 }
  0xf1   : > { %1820 = vmatprep.mubr.msk.f32.mxu1 %vm783_vm1, %v760_v33  ;;  %v1774_v35 = vpop.f32.mrf.mxu0 }
  0xf2   : > { %1821 = vmatmul.mubr.msk.f32.gmra.mxu1 %vm783_vm1, %v761_v30  ;;  %vm691_vm3 = vcmp.ge.f32.partialorder %v589_v34, 0.0  ;;  %v730_v37 = vmul.f32 %v2050_v39, %v589_v34  ;;  %v604_v38 = vadd.f32 %v1774_v35, %v2044_v36  ;;  %v763_v40 = vsel %vm692_vm2, %v594_v29, %v731_v32 }
  0xf3   : > { %v598_v41 = vpop.f32.mrf.mxu0 }
  0xf4   : > { %vm694_vm4 = vcmp.ge.f32.partialorder %v604_v38, 0.0  ;;  %v733_v42 = vmul.f32 %v2050_v39, %v604_v38  ;;  %v762_v43 = vsel %vm691_vm3, %v589_v34, %v730_v37  ;;  %v599_v44 = vadd.f32 %v2044_v36, %v598_v41 }
  0xf5   : > { %1823 = vmatprep.mubr.msk.f32.mxu1 %vm783_vm1, %v762_v43  ;;  %v1777_v45 = vpop.f32.mrf.mxu0 }
  0xf6   : > { %1824 = vmatmul.mubr.msk.f32.gmra.mxu1 %vm783_vm1, %v763_v40  ;;  %vm693_vm5 = vcmp.ge.f32.partialorder %v599_v44, 0.0  ;;  %v732_v46 = vmul.f32 %v2050_v39, %v599_v44  ;;  %v614_v47 = vadd.f32 %v1777_v45, %v2044_v36  ;;  %v765_v48 = vsel %vm694_vm4, %v604_v38, %v733_v42 }
  0xf7   : > { %v608_v49 = vpop.f32.mrf.mxu0 }
  0xf8   : > { %vm696_vm6 = vcmp.ge.f32.partialorder %v614_v47, 0.0  ;;  %v735_v50 = vmul.f32 %v2050_v39, %v614_v47  ;;  %v764_v51 = vsel %vm693_vm5, %v599_v44, %v732_v46  ;;  %v609_v52 = vadd.f32 %v2044_v36, %v608_v49 }
  0xf9   : > { %1826 = vmatprep.mubr.msk.f32.mxu1 %vm783_vm1, %v764_v51  ;;  %v1780_v53 = vpop.f32.mrf.mxu0 }
  0xfa   : > { %1827 = vmatmul.mubr.msk.f32.gmra.mxu1 %vm783_vm1, %v765_v48  ;;  %vm695_vm7 = vcmp.ge.f32.partialorder %v609_v52, 0.0  ;;  %v734_v54 = vmul.f32 %v2050_v39, %v609_v52  ;;  %v624_v55 = vadd.f32 %v1780_v53, %v2044_v36  ;;  %v767_v56 = vsel %vm696_vm6, %v614_v47, %v735_v50 }
  0xfb   : > { %v618_v57 = vpop.f32.mrf.mxu0 }
  0xfc   : > { %vm698_vm8 = vcmp.ge.f32.partialorder %v624_v55, 0.0  ;;  %v737_v58 = vmul.f32 %v2050_v39, %v624_v55  ;;  %v766_v59 = vsel %vm695_vm7, %v609_v52, %v734_v54  ;;  %v619_v60 = vadd.f32 %v2044_v36, %v618_v57 }
  0xfd   : > { %1829 = vmatprep.mubr.msk.f32.mxu1 %vm783_vm1, %v766_v59  ;;  %v1783_v61 = vpop.f32.mrf.mxu0 }
  0xfe   : > { %1830 = vmatmul.mubr.msk.f32.gmra.mxu1 %vm783_vm1, %v767_v56  ;;  %vm697_vm9 = vcmp.ge.f32.partialorder %v619_v60, 0.0  ;;  %v736_v62 = vmul.f32 %v2050_v39, %v619_v60  ;;  %v634_v63 = vadd.f32 %v1783_v61, %v2044_v36  ;;  %v769_v0 = vsel %vm698_vm8, %v624_v55, %v737_v58 }
  0xff   : > { %v628_v1 = vpop.f32.mrf.mxu0 }
 0x100   : > { %vm700_vm10 = vcmp.ge.f32.partialorder %v634_v63, 0.0  ;;  %v739_v2 = vmul.f32 %v2050_v39, %v634_v63  ;;  %v768_v3 = vsel %vm697_vm9, %v619_v60, %v736_v62  ;;  %v629_v4 = vadd.f32 %v2044_v36, %v628_v1 }
 0x101   : > { %1832 = vmatprep.mubr.msk.f32.mxu1 %vm783_vm1, %v768_v3  ;;  %v1786_v5 = vpop.f32.mrf.mxu0 }
 0x102   : > { %1833 = vmatmul.mubr.msk.f32.gmra.mxu1 %vm783_vm1, %v769_v0  ;;  %vm699_vm11 = vcmp.ge.f32.partialorder %v629_v4, 0.0  ;;  %v738_v6 = vmul.f32 %v2050_v39, %v629_v4  ;;  %v644_v7 = vadd.f32 %v1786_v5, %v2044_v36  ;;  %v771_v8 = vsel %vm700_vm10, %v634_v63, %v739_v2 }
 0x103   : > { %v638_v9 = vpop.f32.mrf.mxu0 }
 0x104   : > { %vm702_vm12 = vcmp.ge.f32.partialorder %v644_v7, 0.0  ;;  %v741_v10 = vmul.f32 %v2050_v39, %v644_v7  ;;  %v770_v11 = vsel %vm699_vm11, %v629_v4, %v738_v6  ;;  %v639_v12 = vadd.f32 %v2044_v36, %v638_v9 }
 0x105   : > { %1835 = vmatprep.mubr.msk.f32.mxu1 %vm783_vm1, %v770_v11  ;;  %v1789_v13 = vpop.f32.mrf.mxu0 }
 0x106   : > { %1836 = vmatmul.mubr.msk.f32.gmra.mxu1 %vm783_vm1, %v771_v8  ;;  %vm701_vm13 = vcmp.ge.f32.partialorder %v639_v12, 0.0  ;;  %v740_v14 = vmul.f32 %v2050_v39, %v639_v12  ;;  %v654_v15 = vadd.f32 %v1789_v13, %v2044_v36  ;;  %v773_v16 = vsel %vm702_vm12, %v644_v7, %v741_v10 }
 0x107   : > { %v648_v17 = vpop.f32.mrf.mxu0 }
 0x108   : > { %vm704_vm14 = vcmp.ge.f32.partialorder %v654_v15, 0.0  ;;  %v743_v18 = vmul.f32 %v2050_v39, %v654_v15  ;;  %v772_v19 = vsel %vm701_vm13, %v639_v12, %v740_v14  ;;  %v649_v20 = vadd.f32 %v2044_v36, %v648_v17 }
 0x109   : > { %1838 = vmatprep.mubr.msk.f32.mxu1 %vm783_vm1, %v772_v19  ;;  %v1792_v21 = vpop.f32.mrf.mxu0 }
 0x10a   : > { %1839 = vmatmul.mubr.msk.f32.gmra.mxu1 %vm783_vm1, %v773_v16  ;;  %vm703_vm15 = vcmp.ge.f32.partialorder %v649_v20, 0.0  ;;  %v742_v22 = vmul.f32 %v2050_v39, %v649_v20  ;;  %v664_v23 = vadd.f32 %v1792_v21, %v2044_v36  ;;  %v775_v24 = vsel %vm704_vm14, %v654_v15, %v743_v18 }
 0x10b   : > { %v658_v25 = vpop.f32.mrf.mxu0 }
 0x10c   : > { %vm706_vm2 = vcmp.ge.f32.partialorder %v664_v23, 0.0  ;;  %v745_v26 = vmul.f32 %v2050_v39, %v664_v23  ;;  %v774_v27 = vsel %vm703_vm15, %v649_v20, %v742_v22  ;;  %v659_v28 = vadd.f32 %v2044_v36, %v658_v25 }
 0x10d   : > { %1841 = vmatprep.mubr.msk.f32.mxu1 %vm783_vm1, %v774_v27  ;;  %v1795_v29 = vpop.f32.mrf.mxu0 }
 0x10e   : > { %1842 = vmatmul.mubr.msk.f32.gmra.mxu1 %vm783_vm1, %v775_v24  ;;  %vm705_vm3 = vcmp.ge.f32.partialorder %v659_v28, 0.0  ;;  %v744_v30 = vmul.f32 %v2050_v39, %v659_v28  ;;  %v674_v31 = vadd.f32 %v1795_v29, %v2044_v36  ;;  %v777_v32 = vsel %vm706_vm2, %v664_v23, %v745_v26 }
 0x10f   : > { %v668_v33 = vpop.f32.mrf.mxu0 }
 0x110   : > { %vm708_vm4 = vcmp.ge.f32.partialorder %v674_v31, 0.0  ;;  %v747_v34 = vmul.f32 %v2050_v39, %v674_v31  ;;  %v776_v35 = vsel %vm705_vm3, %v659_v28, %v744_v30  ;;  %v669_v37 = vadd.f32 %v2044_v36, %v668_v33 }
 0x111   : > { %1844 = vmatprep.mubr.msk.f32.mxu1 %vm783_vm1, %v776_v35 }
 0x112   : > { %1845 = vmatmul.mubr.msk.f32.gmra.mxu1 %vm783_vm1, %v777_v32  ;;  %vm707_vm5 = vcmp.ge.f32.partialorder %v669_v37, 0.0  ;;  %v746_v38 = vmul.f32 %v2050_v39, %v669_v37  ;;  %v779_v40 = vsel %vm708_vm4, %v674_v31, %v747_v34 }
 0x114   : > { %v778_v41 = vsel %vm707_vm5, %v669_v37, %v746_v38 }
 0x115   : > { %1847 = vmatprep.mubr.msk.f32.mxu1 %vm783_vm1, %v778_v41 }
 0x116   : > { %1848 = vmatmul.mubr.msk.f32.gmra.mxu1 %vm783_vm1, %v779_v40  ;;  %vm1394_vm1 = vcmask 31744  }
 0x19a   : > { %v1804_v36 = vpop.f32.mrf.mxu1 }
 0x19b   : > { %1106 = vst.msk [vmem:[%s2151_s20 + $0x8] sm:$0xff] %vm355_vm0, %v1804_v36  ;;  %1300 = vrot.lane.b32.xlu1 %v1804_v36, %s1900_s25  ;;  %1171 = vrot.lane.b32.xlu0 %v1804_v36, %s1901_s26 }
 0x19c   : > { %v946_v39 = vpop.f32.mrf.mxu1 }
 0x19d   : > { %1105 = vst.msk [vmem:[%s2151_s20] sm:$0xff] %vm355_vm0, %v946_v39 }
 0x19e   : > { %v1807_v42 = vpop.f32.mrf.mxu1 }
 0x19f   : > { %1108 = vst.msk [vmem:[%s2151_s20 + $0x18] sm:$0xff] %vm355_vm0, %v1807_v42  ;;  %1169 = vrot.lane.b32.xlu0 %v946_v39, %s1901_s26  ;;  %1175 = vrot.lane.b32.xlu1 %v1807_v42, %s1901_s26 }
 0x1a0   : > { %v956_v43 = vpop.f32.mrf.mxu1 }
 0x1a1   : > { %1107 = vst.msk [vmem:[%s2151_s20 + $0x10] sm:$0xff] %vm355_vm0, %v956_v43 }
 0x1a2   : > { %v1810_v44 = vpop.f32.mrf.mxu1 }
 0x1a3   : > { %1110 = vst.msk [vmem:[%s2151_s20 + $0x28] sm:$0xff] %vm355_vm0, %v1810_v44  ;;  %1298 = vrot.lane.b32.xlu0 %v946_v39, %s1900_s25  ;;  %1304 = vrot.lane.b32.xlu1 %v1807_v42, %s1900_s25 }
 0x1a4   : > { %v966_v45 = vpop.f32.mrf.mxu1 }
 0x1a5   : > { %1109 = vst.msk [vmem:[%s2151_s20 + $0x20] sm:$0xff] %vm355_vm0, %v966_v45 }
 0x1a6   : > { %v1813_v46 = vpop.f32.mrf.mxu1 }
 0x1a7   : > { %1302 = vrot.lane.b32.xlu0 %v956_v43, %s1900_s25  ;;  %1173 = vrot.lane.b32.xlu1 %v956_v43, %s1901_s26  ;;  %1112 = vst.msk [vmem:[%s2151_s20 + $0x38] sm:$0xff] %vm355_vm0, %v1813_v46 }
 0x1a8   : > { %v976_v47 = vpop.f32.mrf.mxu1 }
 0x1a9   : > { %1111 = vst.msk [vmem:[%s2151_s20 + $0x30] sm:$0xff] %vm355_vm0, %v976_v47 }
 0x1aa   : > { %v1816_v48 = vpop.f32.mrf.mxu1 }
 0x1ab   : > { %1179 = vrot.lane.b32.xlu1 %v1810_v44, %s1901_s26  ;;  %1177 = vrot.lane.b32.xlu0 %v966_v45, %s1901_s26  ;;  %1114 = vst.msk [vmem:[%s2151_s20 + $0x48] sm:$0xff] %vm355_vm0, %v1816_v48 }
 0x1ac   : > { %v986_v49 = vpop.f32.mrf.mxu1 }
 0x1ad   : > { %1113 = vst.msk [vmem:[%s2151_s20 + $0x40] sm:$0xff] %vm355_vm0, %v986_v49 }
 0x1ae   : > { %v1819_v50 = vpop.f32.mrf.mxu1 }
 0x1af   : > { %1308 = vrot.lane.b32.xlu1 %v1810_v44, %s1900_s25  ;;  %1306 = vrot.lane.b32.xlu0 %v966_v45, %s1900_s25  ;;  %1116 = vst.msk [vmem:[%s2151_s20 + $0x58] sm:$0xff] %vm355_vm0, %v1819_v50 }
 0x1b0   : > { %v996_v51 = vpop.f32.mrf.mxu1 }
 0x1b1   : > { %1115 = vst.msk [vmem:[%s2151_s20 + $0x50] sm:$0xff] %vm355_vm0, %v996_v51 }
 0x1b2   : > { %v1822_v52 = vpop.f32.mrf.mxu1 }
 0x1b3   : > { %1183 = vrot.lane.b32.xlu1 %v1813_v46, %s1901_s26  ;;  %1181 = vrot.lane.b32.xlu0 %v976_v47, %s1901_s26  ;;  %1118 = vst.msk [vmem:[%s2151_s20 + $0x68] sm:$0xff] %vm355_vm0, %v1822_v52 }
 0x1b4   : > { %v1006_v53 = vpop.f32.mrf.mxu1 }
 0x1b5   : > { %1117 = vst.msk [vmem:[%s2151_s20 + $0x60] sm:$0xff] %vm355_vm0, %v1006_v53 }
 0x1b6   : > { %v1825_v54 = vpop.f32.mrf.mxu1 }
 0x1b7   : > { %1312 = vrot.lane.b32.xlu1 %v1813_v46, %s1900_s25  ;;  %1310 = vrot.lane.b32.xlu0 %v976_v47, %s1900_s25  ;;  %1120 = vst.msk [vmem:[%s2151_s20 + $0x78] sm:$0xff] %vm355_vm0, %v1825_v54 }
 0x1b8   : > { %v1016_v55 = vpop.f32.mrf.mxu1 }
 0x1b9   : > { %1119 = vst.msk [vmem:[%s2151_s20 + $0x70] sm:$0xff] %vm355_vm0, %v1016_v55 }
 0x1ba   : > { %v1828_v56 = vpop.f32.mrf.mxu1 }
 0x1bb   : > { %1187 = vrot.lane.b32.xlu1 %v1816_v48, %s1901_s26  ;;  %1185 = vrot.lane.b32.xlu0 %v986_v49, %s1901_s26  ;;  %1122 = vst.msk [vmem:[%s2151_s20 + $0x88] sm:$0xff] %vm355_vm0, %v1828_v56 }
 0x1bc   : > { %v1026_v57 = vpop.f32.mrf.mxu1 }
 0x1bd   : > { %1121 = vst.msk [vmem:[%s2151_s20 + $0x80] sm:$0xff] %vm355_vm0, %v1026_v57 }
 0x1be   : > { %v1831_v58 = vpop.f32.mrf.mxu1 }
 0x1bf   : > { %1316 = vrot.lane.b32.xlu1 %v1816_v48, %s1900_s25  ;;  %1314 = vrot.lane.b32.xlu0 %v986_v49, %s1900_s25  ;;  %1124 = vst.msk [vmem:[%s2151_s20 + $0x98] sm:$0xff] %vm355_vm0, %v1831_v58 }
 0x1c0   : > { %v1036_v59 = vpop.f32.mrf.mxu1 }
 0x1c1   : > { %1123 = vst.msk [vmem:[%s2151_s20 + $0x90] sm:$0xff] %vm355_vm0, %v1036_v59 }
 0x1c2   : > { %v1834_v60 = vpop.f32.mrf.mxu1 }
 0x1c3   : > { %1191 = vrot.lane.b32.xlu1 %v1819_v50, %s1901_s26  ;;  %1189 = vrot.lane.b32.xlu0 %v996_v51, %s1901_s26  ;;  %1126 = vst.msk [vmem:[%s2151_s20 + $0xa8] sm:$0xff] %vm355_vm0, %v1834_v60 }
 0x1c4   : > { %v1046_v61 = vpop.f32.mrf.mxu1 }
 0x1c5   : > { %1125 = vst.msk [vmem:[%s2151_s20 + $0xa0] sm:$0xff] %vm355_vm0, %v1046_v61 }
 0x1c6   : > { %v1837_v62 = vpop.f32.mrf.mxu1 }
 0x1c7   : > { %1320 = vrot.lane.b32.xlu1 %v1819_v50, %s1900_s25  ;;  %1318 = vrot.lane.b32.xlu0 %v996_v51, %s1900_s25  ;;  %1128 = vst.msk [vmem:[%s2151_s20 + $0xb8] sm:$0xff] %vm355_vm0, %v1837_v62 }
 0x1c8   : > { %v1056_v63 = vpop.f32.mrf.mxu1 }
 0x1c9   : > { %1127 = vst.msk [vmem:[%s2151_s20 + $0xb0] sm:$0xff] %vm355_vm0, %v1056_v63 }
 0x1ca   : > { %v1840_v0 = vpop.f32.mrf.mxu1 }
 0x1cb   : > { %1195 = vrot.lane.b32.xlu1 %v1822_v52, %s1901_s26  ;;  %1193 = vrot.lane.b32.xlu0 %v1006_v53, %s1901_s26  ;;  %1130 = vst.msk [vmem:[%s2151_s20 + $0xc8] sm:$0xff] %vm355_vm0, %v1840_v0 }
 0x1cc   : > { %v1066_v1 = vpop.f32.mrf.mxu1 }
 0x1cd   : > { %1129 = vst.msk [vmem:[%s2151_s20 + $0xc0] sm:$0xff] %vm355_vm0, %v1066_v1 }
 0x1ce   : > { %v1843_v2 = vpop.f32.mrf.mxu1 }
 0x1cf   : > { %1324 = vrot.lane.b32.xlu1 %v1822_v52, %s1900_s25  ;;  %1322 = vrot.lane.b32.xlu0 %v1006_v53, %s1900_s25  ;;  %1132 = vst.msk [vmem:[%s2151_s20 + $0xd8] sm:$0xff] %vm355_vm0, %v1843_v2 }
 0x1d0   : > { %v1076_v3 = vpop.f32.mrf.mxu1 }
 0x1d1   : > { %1131 = vst.msk [vmem:[%s2151_s20 + $0xd0] sm:$0xff] %vm355_vm0, %v1076_v3 }
 0x1d2   : > { %v1846_v4 = vpop.f32.mrf.mxu1 }
 0x1d3   : > { %1199 = vrot.lane.b32.xlu1 %v1825_v54, %s1901_s26  ;;  %1197 = vrot.lane.b32.xlu0 %v1016_v55, %s1901_s26  ;;  %1134 = vst.msk [vmem:[%s2151_s20 + $0xe8] sm:$0xff] %vm355_vm0, %v1846_v4 }
 0x1d4   : > { %v1086_v5 = vpop.f32.mrf.mxu1 }
 0x1d5   : > { %1133 = vst.msk [vmem:[%s2151_s20 + $0xe0] sm:$0xff] %vm355_vm0, %v1086_v5 }
 0x1d6   : > { %v1849_v6 = vpop.f32.mrf.mxu1 }
 0x1d7   : > { %1328 = vrot.lane.b32.xlu1 %v1825_v54, %s1900_s25  ;;  %1326 = vrot.lane.b32.xlu0 %v1016_v55, %s1900_s25  ;;  %1136 = vst.msk [vmem:[%s2151_s20 + $0xf8] sm:$0xff] %vm355_vm0, %v1849_v6 }
 0x1d8   : > { %v1096_v7 = vpop.f32.mrf.mxu1 }
 0x1d9   : > { %1135 = vst.msk [vmem:[%s2151_s20 + $0xf0] sm:$0xff] %vm355_vm0, %v1096_v7 }
 0x1db   : > { %1203 = vrot.lane.b32.xlu1 %v1828_v56, %s1901_s26  ;;  %1201 = vrot.lane.b32.xlu0 %v1026_v57, %s1901_s26 }
 0x1df   : > { %1332 = vrot.lane.b32.xlu1 %v1828_v56, %s1900_s25  ;;  %1330 = vrot.lane.b32.xlu0 %v1026_v57, %s1900_s25 }
 0x1e3   : > { %1207 = vrot.lane.b32.xlu1 %v1831_v58, %s1901_s26  ;;  %1205 = vrot.lane.b32.xlu0 %v1036_v59, %s1901_s26 }
 0x1e7   : > { %1336 = vrot.lane.b32.xlu1 %v1831_v58, %s1900_s25  ;;  %1334 = vrot.lane.b32.xlu0 %v1036_v59, %s1900_s25 }
 0x1eb   : > { %1211 = vrot.lane.b32.xlu1 %v1834_v60, %s1901_s26  ;;  %1209 = vrot.lane.b32.xlu0 %v1046_v61, %s1901_s26 }
 0x1ef   : > { %1340 = vrot.lane.b32.xlu1 %v1834_v60, %s1900_s25  ;;  %1338 = vrot.lane.b32.xlu0 %v1046_v61, %s1900_s25 }
 0x1f3   : > { %1215 = vrot.lane.b32.xlu1 %v1837_v62, %s1901_s26  ;;  %1213 = vrot.lane.b32.xlu0 %v1056_v63, %s1901_s26 }
 0x1f7   : > { %1344 = vrot.lane.b32.xlu1 %v1837_v62, %s1900_s25  ;;  %1342 = vrot.lane.b32.xlu0 %v1056_v63, %s1900_s25 }
 0x1fb   : > { %1219 = vrot.lane.b32.xlu1 %v1840_v0, %s1901_s26  ;;  %1217 = vrot.lane.b32.xlu0 %v1066_v1, %s1901_s26 }
 0x1ff   : > { %1348 = vrot.lane.b32.xlu1 %v1840_v0, %s1900_s25  ;;  %1346 = vrot.lane.b32.xlu0 %v1066_v1, %s1900_s25 }
 0x203   : > { %1223 = vrot.lane.b32.xlu1 %v1843_v2, %s1901_s26  ;;  %1221 = vrot.lane.b32.xlu0 %v1076_v3, %s1901_s26 }
 0x207   : > { %1352 = vrot.lane.b32.xlu1 %v1843_v2, %s1900_s25  ;;  %1350 = vrot.lane.b32.xlu0 %v1076_v3, %s1900_s25 }
 0x20b   : > { %1227 = vrot.lane.b32.xlu1 %v1846_v4, %s1901_s26  ;;  %1225 = vrot.lane.b32.xlu0 %v1086_v5, %s1901_s26 }
 0x20d   : > { %v1301_v8 = vpop.permute.xlu1 %1300  ;;  %v1172_v9 = vpop.permute.xlu0 %1171 }
 0x20e   : > { %1396 = vst.msk [vmem:[%s2280_s30 + $0x8] sm:$0xff] %vm1394_vm1, %v1301_v8 }
 0x20f   : > { %1642 = vst.msk [vmem:[%s2151_s20 + $0x108] sm:$0xff] %vm355_vm0, %v1172_v9  ;;  %1356 = vrot.lane.b32.xlu1 %v1846_v4, %s1900_s25  ;;  %1354 = vrot.lane.b32.xlu0 %v1086_v5, %s1900_s25 }
 0x211   : > { %v1170_v10 = vpop.permute.xlu0 %1169  ;;  %v1176_v11 = vpop.permute.xlu1 %1175 }
 0x212   : > { %1641 = vst.msk [vmem:[%s2151_s20 + $0x100] sm:$0xff] %vm355_vm0, %v1170_v10  ;;  %1644 = vst.msk [vmem:[%s2151_s20 + $0x118] sm:$0xff] %vm355_vm0, %v1176_v11 }
 0x213   : > { %1231 = vrot.lane.b32.xlu1 %v1849_v6, %s1901_s26  ;;  %1229 = vrot.lane.b32.xlu0 %v1096_v7, %s1901_s26 }
 0x215   : > { %v1299_v12 = vpop.permute.xlu0 %1298  ;;  %v1305_v13 = vpop.permute.xlu1 %1304 }
 0x216   : > { %1395 = vst.msk [vmem:[%s2280_s30] sm:$0xff] %vm1394_vm1, %v1299_v12  ;;  %1398 = vst.msk [vmem:[%s2280_s30 + $0x18] sm:$0xff] %vm1394_vm1, %v1305_v13 }
 0x217   : > { %1360 = vrot.lane.b32.xlu1 %v1849_v6, %s1900_s25  ;;  %1358 = vrot.lane.b32.xlu0 %v1096_v7, %s1900_s25 }
 0x219   : > { %v1303_v14 = vpop.permute.xlu0 %1302  ;;  %v1174_v15 = vpop.permute.xlu1 %1173 }
 0x21a   : > { %1397 = vst.msk [vmem:[%s2280_s30 + $0x10] sm:$0xff] %vm1394_vm1, %v1303_v14 }
 0x21b   : > { %1643 = vst.msk [vmem:[%s2151_s20 + $0x110] sm:$0xff] %vm355_vm0, %v1174_v15 }
 0x21d   : > { %v1180_v16 = vpop.permute.xlu1 %1179  ;;  %v1178_v17 = vpop.permute.xlu0 %1177 }
 0x21e   : > { %1646 = vst.msk [vmem:[%s2151_s20 + $0x128] sm:$0xff] %vm355_vm0, %v1180_v16  ;;  %1645 = vst.msk [vmem:[%s2151_s20 + $0x120] sm:$0xff] %vm355_vm0, %v1178_v17 }
 0x221   : > { %v1309_v18 = vpop.permute.xlu1 %1308  ;;  %v1307_v19 = vpop.permute.xlu0 %1306 }
 0x222   : > { %1400 = vst.msk [vmem:[%s2280_s30 + $0x28] sm:$0xff] %vm1394_vm1, %v1309_v18  ;;  %1399 = vst.msk [vmem:[%s2280_s30 + $0x20] sm:$0xff] %vm1394_vm1, %v1307_v19 }
 0x225   : > { %v1184_v20 = vpop.permute.xlu1 %1183  ;;  %v1182_v21 = vpop.permute.xlu0 %1181 }
 0x226   : > { %1648 = vst.msk [vmem:[%s2151_s20 + $0x138] sm:$0xff] %vm355_vm0, %v1184_v20  ;;  %1647 = vst.msk [vmem:[%s2151_s20 + $0x130] sm:$0xff] %vm355_vm0, %v1182_v21 }
 0x229   : > { %v1313_v22 = vpop.permute.xlu1 %1312  ;;  %v1311_v23 = vpop.permute.xlu0 %1310 }
 0x22a   : > { %1402 = vst.msk [vmem:[%s2280_s30 + $0x38] sm:$0xff] %vm1394_vm1, %v1313_v22  ;;  %1401 = vst.msk [vmem:[%s2280_s30 + $0x30] sm:$0xff] %vm1394_vm1, %v1311_v23 }
 0x22d   : > { %v1188_v24 = vpop.permute.xlu1 %1187  ;;  %v1186_v25 = vpop.permute.xlu0 %1185 }
 0x22e   : > { %1650 = vst.msk [vmem:[%s2151_s20 + $0x148] sm:$0xff] %vm355_vm0, %v1188_v24  ;;  %1649 = vst.msk [vmem:[%s2151_s20 + $0x140] sm:$0xff] %vm355_vm0, %v1186_v25 }
 0x231   : > { %v1317_v26 = vpop.permute.xlu1 %1316  ;;  %v1315_v27 = vpop.permute.xlu0 %1314 }
 0x232   : > { %1404 = vst.msk [vmem:[%s2280_s30 + $0x48] sm:$0xff] %vm1394_vm1, %v1317_v26  ;;  %1403 = vst.msk [vmem:[%s2280_s30 + $0x40] sm:$0xff] %vm1394_vm1, %v1315_v27 }
 0x235   : > { %v1192_v28 = vpop.permute.xlu1 %1191  ;;  %v1190_v29 = vpop.permute.xlu0 %1189 }
 0x236   : > { %1652 = vst.msk [vmem:[%s2151_s20 + $0x158] sm:$0xff] %vm355_vm0, %v1192_v28  ;;  %1651 = vst.msk [vmem:[%s2151_s20 + $0x150] sm:$0xff] %vm355_vm0, %v1190_v29 }
 0x239   : > { %v1321_v30 = vpop.permute.xlu1 %1320  ;;  %v1319_v31 = vpop.permute.xlu0 %1318 }
 0x23a   : > { %1406 = vst.msk [vmem:[%s2280_s30 + $0x58] sm:$0xff] %vm1394_vm1, %v1321_v30  ;;  %1405 = vst.msk [vmem:[%s2280_s30 + $0x50] sm:$0xff] %vm1394_vm1, %v1319_v31 }
 0x23d   : > { %v1196_v32 = vpop.permute.xlu1 %1195  ;;  %v1194_v33 = vpop.permute.xlu0 %1193 }
 0x23e   : > { %1654 = vst.msk [vmem:[%s2151_s20 + $0x168] sm:$0xff] %vm355_vm0, %v1196_v32  ;;  %1653 = vst.msk [vmem:[%s2151_s20 + $0x160] sm:$0xff] %vm355_vm0, %v1194_v33 }
 0x241   : > { %v1325_v34 = vpop.permute.xlu1 %1324  ;;  %v1323_v35 = vpop.permute.xlu0 %1322 }
 0x242   : > { %1408 = vst.msk [vmem:[%s2280_s30 + $0x68] sm:$0xff] %vm1394_vm1, %v1325_v34  ;;  %1407 = vst.msk [vmem:[%s2280_s30 + $0x60] sm:$0xff] %vm1394_vm1, %v1323_v35 }
 0x245   : > { %v1200_v37 = vpop.permute.xlu1 %1199  ;;  %v1198_v38 = vpop.permute.xlu0 %1197 }
 0x246   : > { %1656 = vst.msk [vmem:[%s2151_s20 + $0x178] sm:$0xff] %vm355_vm0, %v1200_v37  ;;  %1655 = vst.msk [vmem:[%s2151_s20 + $0x170] sm:$0xff] %vm355_vm0, %v1198_v38 }
 0x249   : > { %v1329_v40 = vpop.permute.xlu1 %1328  ;;  %v1327_v41 = vpop.permute.xlu0 %1326 }
 0x24a   : > { %1410 = vst.msk [vmem:[%s2280_s30 + $0x78] sm:$0xff] %vm1394_vm1, %v1329_v40  ;;  %1409 = vst.msk [vmem:[%s2280_s30 + $0x70] sm:$0xff] %vm1394_vm1, %v1327_v41 }
 0x24d   : > { %v1204_v36 = vpop.permute.xlu1 %1203  ;;  %v1202_v39 = vpop.permute.xlu0 %1201 }
 0x24e   : > { %1658 = vst.msk [vmem:[%s2151_s20 + $0x188] sm:$0xff] %vm355_vm0, %v1204_v36  ;;  %1657 = vst.msk [vmem:[%s2151_s20 + $0x180] sm:$0xff] %vm355_vm0, %v1202_v39 }
 0x251   : > { %v1333_v42 = vpop.permute.xlu1 %1332  ;;  %v1331_v43 = vpop.permute.xlu0 %1330 }
 0x252   : > { %1412 = vst.msk [vmem:[%s2280_s30 + $0x88] sm:$0xff] %vm1394_vm1, %v1333_v42  ;;  %1411 = vst.msk [vmem:[%s2280_s30 + $0x80] sm:$0xff] %vm1394_vm1, %v1331_v43 }
 0x255   : > { %v1208_v44 = vpop.permute.xlu1 %1207  ;;  %v1206_v45 = vpop.permute.xlu0 %1205 }
 0x256   : > { %1660 = vst.msk [vmem:[%s2151_s20 + $0x198] sm:$0xff] %vm355_vm0, %v1208_v44  ;;  %1659 = vst.msk [vmem:[%s2151_s20 + $0x190] sm:$0xff] %vm355_vm0, %v1206_v45 }
 0x259   : > { %v1337_v46 = vpop.permute.xlu1 %1336  ;;  %v1335_v47 = vpop.permute.xlu0 %1334 }
 0x25a   : > { %1414 = vst.msk [vmem:[%s2280_s30 + $0x98] sm:$0xff] %vm1394_vm1, %v1337_v46  ;;  %1413 = vst.msk [vmem:[%s2280_s30 + $0x90] sm:$0xff] %vm1394_vm1, %v1335_v47 }
 0x25d   : > { %v1212_v48 = vpop.permute.xlu1 %1211  ;;  %v1210_v49 = vpop.permute.xlu0 %1209 }
 0x25e   : > { %1662 = vst.msk [vmem:[%s2151_s20 + $0x1a8] sm:$0xff] %vm355_vm0, %v1212_v48  ;;  %1661 = vst.msk [vmem:[%s2151_s20 + $0x1a0] sm:$0xff] %vm355_vm0, %v1210_v49 }
 0x261   : > { %v1341_v50 = vpop.permute.xlu1 %1340  ;;  %v1339_v51 = vpop.permute.xlu0 %1338 }
 0x262   : > { %1416 = vst.msk [vmem:[%s2280_s30 + $0xa8] sm:$0xff] %vm1394_vm1, %v1341_v50  ;;  %1415 = vst.msk [vmem:[%s2280_s30 + $0xa0] sm:$0xff] %vm1394_vm1, %v1339_v51 }
 0x265   : > { %v1216_v52 = vpop.permute.xlu1 %1215  ;;  %v1214_v53 = vpop.permute.xlu0 %1213 }
 0x266   : > { %1664 = vst.msk [vmem:[%s2151_s20 + $0x1b8] sm:$0xff] %vm355_vm0, %v1216_v52  ;;  %1663 = vst.msk [vmem:[%s2151_s20 + $0x1b0] sm:$0xff] %vm355_vm0, %v1214_v53 }
 0x269   : > { %v1345_v54 = vpop.permute.xlu1 %1344  ;;  %v1343_v55 = vpop.permute.xlu0 %1342 }
 0x26a   : > { %1418 = vst.msk [vmem:[%s2280_s30 + $0xb8] sm:$0xff] %vm1394_vm1, %v1345_v54  ;;  %1417 = vst.msk [vmem:[%s2280_s30 + $0xb0] sm:$0xff] %vm1394_vm1, %v1343_v55 }
 0x26d   : > { %v1220_v56 = vpop.permute.xlu1 %1219  ;;  %v1218_v57 = vpop.permute.xlu0 %1217 }
 0x26e   : > { %1666 = vst.msk [vmem:[%s2151_s20 + $0x1c8] sm:$0xff] %vm355_vm0, %v1220_v56  ;;  %1665 = vst.msk [vmem:[%s2151_s20 + $0x1c0] sm:$0xff] %vm355_vm0, %v1218_v57 }
 0x271   : > { %v1349_v58 = vpop.permute.xlu1 %1348  ;;  %v1347_v59 = vpop.permute.xlu0 %1346 }
 0x272   : > { %1420 = vst.msk [vmem:[%s2280_s30 + $0xc8] sm:$0xff] %vm1394_vm1, %v1349_v58  ;;  %1419 = vst.msk [vmem:[%s2280_s30 + $0xc0] sm:$0xff] %vm1394_vm1, %v1347_v59 }
 0x275   : > { %v1224_v60 = vpop.permute.xlu1 %1223  ;;  %v1222_v61 = vpop.permute.xlu0 %1221 }
 0x276   : > { %1668 = vst.msk [vmem:[%s2151_s20 + $0x1d8] sm:$0xff] %vm355_vm0, %v1224_v60  ;;  %1667 = vst.msk [vmem:[%s2151_s20 + $0x1d0] sm:$0xff] %vm355_vm0, %v1222_v61 }
 0x279   : > { %v1353_v62 = vpop.permute.xlu1 %1352  ;;  %v1351_v63 = vpop.permute.xlu0 %1350 }
 0x27a   : > { %1422 = vst.msk [vmem:[%s2280_s30 + $0xd8] sm:$0xff] %vm1394_vm1, %v1353_v62  ;;  %1421 = vst.msk [vmem:[%s2280_s30 + $0xd0] sm:$0xff] %vm1394_vm1, %v1351_v63 }
 0x27d   : > { %v1228_v0 = vpop.permute.xlu1 %1227  ;;  %v1226_v1 = vpop.permute.xlu0 %1225 }
 0x27e   : > { %1670 = vst.msk [vmem:[%s2151_s20 + $0x1e8] sm:$0xff] %vm355_vm0, %v1228_v0  ;;  %1669 = vst.msk [vmem:[%s2151_s20 + $0x1e0] sm:$0xff] %vm355_vm0, %v1226_v1 }
 0x281   : > { %v1357_v2 = vpop.permute.xlu1 %1356  ;;  %v1355_v3 = vpop.permute.xlu0 %1354 }
 0x282   : > { %1424 = vst.msk [vmem:[%s2280_s30 + $0xe8] sm:$0xff] %vm1394_vm1, %v1357_v2  ;;  %1423 = vst.msk [vmem:[%s2280_s30 + $0xe0] sm:$0xff] %vm1394_vm1, %v1355_v3 }
 0x285   : > { %v1232_v4 = vpop.permute.xlu1 %1231  ;;  %v1230_v5 = vpop.permute.xlu0 %1229 }
 0x286   : > { %1672 = vst.msk [vmem:[%s2151_s20 + $0x1f8] sm:$0xff] %vm355_vm0, %v1232_v4  ;;  %1671 = vst.msk [vmem:[%s2151_s20 + $0x1f0] sm:$0xff] %vm355_vm0, %v1230_v5 }
 0x289   : > { %v1361_v6 = vpop.permute.xlu1 %1360  ;;  %v1359_v7 = vpop.permute.xlu0 %1358 }
 0x28a   : > { %1426 = vst.msk [vmem:[%s2280_s30 + $0xf8] sm:$0xff] %vm1394_vm1, %v1361_v6  ;;  %1425 = vst.msk [vmem:[%s2280_s30 + $0xf0] sm:$0xff] %vm1394_vm1, %v1359_v7 }
 0x28b PF: > { %s17_s23 = sadd.s32 1, %s1898_s23   ;;  %s2432_s21 = smov %s1894_s22 }
 0x28c   : > { %p14_p5 = scmp.ge.s32.totalorder %s17_s23, 4   ;;  %s2433_s22 = smov %s2435_s24 }
 0x28e   :  { %16 = sbr.rel (!%p14_p5) target bundleno = 2 (0x2), region = 83 }

// kernel: _lambda_.3
= control target key start
LH: loop header
LB: loop body
LE: loop exit
PB: predicated region body
PF: predicated region fallthrough
CT: control target
= control target key end

     0   :  { %s857_s15 = smov 0   ;;  %s859_s16 = smov 0   ;;  %s1003_s0 = inlined_call_operand.vmem [shape: f32[2,2,16,128], index: 0, kind: input, shape index: {}]   ;;  %s1004_s1 = inlined_call_operand.vmem [shape: f32[2,16,64], index: 1, kind: input, shape index: {}]   ;;  %s1005_s2 = inlined_call_operand.vmem [shape: f32[2,16,16], index: 2, kind: input, shape index: {}]   ;;  %s1006_s3 = inlined_call_operand.vmem [shape: f32[64,128], index: 3, kind: input, shape index: {}]   ;;  %s1007_s4 = inlined_call_operand.vmem [shape: f32[2,16,256], index: 4, kind: output, shape index: {}]  }
   0x1   :  { %s861_s17 = smov 0   ;;  %s863_s18 = smov 0  }
   0x2   :  { %s865_s19 = smov 0   ;;  %s867_s20 = smov 0  }
   0x3   :  { %s869_s21 = smov 0  }
   0x4 LB: > { %s26_s22 = sadd.s32 1, %s822_s19  ;;  %s33_s23 = sadd.s32 1, %s826_s20  ;;  %s830_s21 = sphi %s869_s21, %s14_s21   ;;  %s826_s20 = sphi %s867_s20, %s1020_s20   ;;  %s822_s19 = sphi %s865_s19, %s1019_s19   ;;  %s818_s18 = sphi %s863_s18, %s1018_s18   ;;  %s814_s17 = sphi %s861_s17, %s1017_s17   ;;  %s810_s16 = sphi %s859_s16, %s1016_s16   ;;  %s806_s15 = sphi %s857_s15, %s1015_s15  }
   0x5   : > { %p27_p0 = scmp.ge.s32.totalorder %s26_s22, 2  ;;  %s654_s24 = sadd.s32 4294967295, %s830_s21  }
   0x6   : > { %p162_p1 = scmp.ne.s32.totalorder %s810_s16, %s806_s15  ;;  %p163_p2 = scmp.eq.s32.totalorder %s654_s24, 3 }
   0x7   : > { %s1022_s22 = smov (%p27_p0, %s26_s22), 0  ;;  %s1024_s23 = smov (!%p27_p0, %s33_s23), %s826_s20 }
   0x8   : > { %1010 = sst [smem:[#allocation4_spill]] %s1022_s22  ;;  %s148_s25 = ssub.s32 %s822_s19, %s1022_s22 }
   0x9   : > { %p35_p3 = scmp.ge.s32.totalorder %s1024_s23, 2  ;;  %p659_p4 = scmp.ge.s32.totalorder %s830_s21, 1 }
   0xa   : > { %p903_p5 = por %p163_p2, %p162_p1  ;;  %p225_p6 = scmp.lt.s32.totalorder %s830_s21, 5 }
   0xb   : > { %s1026_s23 = smov (%p35_p3, %s1024_s23), 0  ;;  %s152_s29 = sadd.s32 1, %s810_s16 }
   0xc   : > { %1012 = sst [smem:[#allocation5_spill]] %s1026_s23  ;;  %p226_p7 = pnand %p659_p4, %p225_p6 }
   0xd   : > { %s147_s27 = ssub.s32 %s826_s20, %s1026_s23  ;;  %s268_s5 = sand.u32 (!%p226_p7), 1, %s806_s15  }
   0xe   : > { %s149_s28 = sor.u32 %s148_s25, %s147_s27  ;;  %229 = sbr.rel (%p226_p7) target bundleno = 459 (0x1cb), region = 36 }
   0xf   : > { %p150_p8 = scmp.eq.s32.totalorder %s149_s28, 0  ;;  %p271_p9 = scmp.lt.s32.totalorder (!%p226_p7), %s818_s18, 1 }
  0x10   : > { %s660_s6 = sshll.u32 (!%p226_p7), %s268_s5, 4  ;;  %p273_p10 = scmp.lt.s32.totalorder (!%p226_p7), %s814_s17, 1 }
  0x11   : > { %s914_s30 = scalar_select %p150_p8, %s810_s16, %s152_s29  }
  0x12   : > { %p668_p11 = scmp.ne.s32.totalorder (!%p226_p7), %s814_s17, 0 }
  0x13   : > { %s272_s7 = scalar_select %p271_p9, %s818_s18, 1 }
  0x14   : > { %s274_s8 = scalar_select %p273_p10, %s814_s17, 1 }
  0x15   : > { %s662_s9 = sshll.u32 %s272_s7, 2  ;;  %s678_s10 = sshll.u32 %s272_s7, 4 }
  0x16   : > { %s661_s11 = sshll.u32 %s274_s8, 1  ;;  %s924_s14 = scalar_lea.vmem %s1004_s1, %s678_s10 }
  0x17   : > { %s280_s24 = sadd.s32 %s662_s9, %s661_s11  ;;  %s679_s25 = sshll.u32 %s274_s8, 4 }
  0x18   : > { %s663_s27 = sshll.u32 %s280_s24, 3  ;;  %s929_s15 = scalar_lea.vmem %s1005_s2, %s679_s25 }
  0x19   : > { %s934_s22 = scalar_lea.vmem %s1003_s0, %s663_s27  ;;  %s936_s7 = scalar_lea.vmem [#allocation3], %s660_s6 }
  0x1a   : > { %301 = sbr.rel (%p668_p11) target bundleno = 244 (0xf4), region = 40 }
  0x1f   : > { %v311_v0 = vld [vmem:[%s1006_s3 + $0x38] sm:$0xff]  ;;  %v310_v1 = vld [vmem:[%s1006_s3 + $0x30] sm:$0xff]  ;;  %vm312_vm0 = vcmask 523264   ;;  %v309_v2 = vld [vmem:[%s1006_s3 + $0x28] sm:$0xff] }
  0x20   : > { %694 = vmatprep.subr.mxu0 %v311_v0  ;;  %v302_v3 = vld [vmem:[%s924_s14] sm:$0xff]  ;;  %v307_v5 = vld [vmem:[%s1006_s3 + $0x18] sm:$0xff]  ;;  %v306_v6 = vld [vmem:[%s1006_s3 + $0x10] sm:$0xff] }
  0x21   : > { %695 = vmatpush3.msra.mxu0 %v311_v0  ;;  %710 = vmatprep.mubr.msk.f32.mxu0 %vm312_vm0, %v302_v3  ;;  %v308_v4 = vld [vmem:[%s1006_s3 + $0x20] sm:$0xff]  ;;  %v305_v7 = vld [vmem:[%s1006_s3 + $0x8] sm:$0xff] }
  0x22   : > { %696 = vmatprep.subr.mxu0 %v310_v1  ;;  %v304_v8 = vld [vmem:[%s1006_s3] sm:$0xff]  ;;  %v303_v9 = vld [vmem:[%s924_s14 + $0x8] sm:$0xff] }
  0x23   : > { %697 = vmatpush3.msra.mxu0 %v310_v1 }
  0x24   : > { %698 = vmatprep.subr.mxu0 %v309_v2 }
  0x25   : > { %699 = vmatpush3.msra.mxu0 %v309_v2 }
  0x26   : > { %700 = vmatprep.subr.mxu0 %v308_v4 }
  0x27   : > { %701 = vmatpush3.msra.mxu0 %v308_v4 }
  0x28   : > { %702 = vmatprep.subr.mxu0 %v307_v5 }
  0x29   : > { %703 = vmatpush3.msra.mxu0 %v307_v5 }
  0x2a   : > { %704 = vmatprep.subr.mxu0 %v306_v6 }
  0x2b   : > { %705 = vmatpush3.msra.mxu0 %v306_v6 }
  0x2c   : > { %706 = vmatprep.subr.mxu0 %v305_v7 }
  0x2d   : > { %707 = vmatpush3.msra.mxu0 %v305_v7 }
  0x2e   : > { %708 = vmatprep.subr.mxu0 %v304_v8 }
  0x2f   : > { %709 = vmatpush3.msra.mxu0 %v304_v8 }
  0x30   : > { %711 = vmatmul.mubr.msk.f32.vlgmr.msra.gmra.mxu0 %vm312_vm0, %v303_v9 }
  0xf0   : > { %v712_v10 = vpop.f32.mrf.mxu0 }
  0xf1   : > { %395 = vst [vmem:[#allocation2 + $0x8] sm:$0xff] %v712_v10 }
  0xf2   : > { %v385_v11 = vpop.f32.mrf.mxu0 }
  0xf3   : > { %394 = vst [vmem:[#allocation2] sm:$0xff] %v385_v11 }
  0xf4 PF: > { %v396_v14 = vld [vmem:[%s929_s15] sm:$0xff]  ;;  %vm402_vm1 = vcmask 130048   ;;  %v397_v15 = vld [vmem:[%s929_s15 + $0x8] sm:$0xff]  ;;  %s674_s14 = sshll.u32 (%p903_p5), %s818_s18, 2 }
  0xf5   : > { %717 = vmatprep.mubr.msk.f32.mxu0 %vm402_vm1, %v396_v14  ;;  %v401_v16 = vld [vmem:[%s934_s22 + $0x8] sm:$0xff]  ;;  %v400_v18 = vld [vmem:[%s934_s22] sm:$0xff]  ;;  %s495_s15 = sadd.s32 (%p903_p5), %s814_s17, %s674_s14 }
  0xf6   : > { %s675_s8 = sshll.u32 (%p903_p5), %s495_s15, 3 }
  0xf7   : > { %s497_s22 = scalar_lea.vmem (%p903_p5), %s1007_s4, %s675_s8 }
  0xf8   : > { %v399_v12 = vld [vmem:[#allocation2 + $0x8] sm:$0xff] }
  0xf9   : > { %713 = vmatprep.subr.mxu0 %v399_v12 }
  0xfa   : > { %v398_v13 = vld [vmem:[#allocation2] sm:$0xff]  ;;  %714 = vmatpush3.msra.mxu0 %v399_v12 }
  0xfb   : > { %715 = vmatprep.subr.mxu0 %v398_v13 }
  0xfc   : > { %716 = vmatpush3.msra.mxu0 %v398_v13 }
  0xfd   : > { %718 = vmatmul.mubr.msk.f32.vlgmr.msra.gmra.mxu0 %vm402_vm1, %v397_v15 }
 0x1bd   : > { %v719_v17 = vpop.f32.mrf.mxu0 }
 0x1be   : > { %v481_v19 = vadd.f32 %v719_v17, %v401_v16  ;;  %492 = sbr.rel (!%p903_p5) target bundleno = 459 (0x1cb), region = 44 }
 0x1bf   : > { %v475_v20 = vpop.f32.mrf.mxu0 }
 0x1c0   : > { %485 = vst [vmem:[%s936_s7 + $0x8] sm:$0xff] %v481_v19  ;;  %v476_v21 = vadd.f32 %v475_v20, %v400_v18 }
 0x1c2   : > { %484 = vst [vmem:[%s936_s7] sm:$0xff] %v476_v21 }
 0x1c7   : > { %v530_v23 = vld [vmem:[%s936_s7 + $0x8] sm:$0xff] }
 0x1c8   : > { %531 = vst [vmem:[%s497_s22 + $0x10] sm:$0xff] %v530_v23 }
 0x1c9   : > { %v528_v22 = vld [vmem:[%s936_s7] sm:$0xff] }
 0x1ca   : > { %529 = vst [vmem:[%s497_s22] sm:$0xff] %v528_v22 }
 0x1cb PF: > { %s14_s21 = sadd.s32 1, %s830_s21   ;;  %s1013_s26 = sld [smem:[#allocation4_spill]] }
 0x1cc   : > { %p11_p12 = scmp.ge.s32.totalorder %s14_s21, 6   ;;  %s1014_s11 = sld [smem:[#allocation5_spill]] }
 0x1cd   : > { %s1015_s15 = smov %s810_s16  ;;  %s1016_s16 = smov %s914_s30 }
 0x1ce   : > { %s1017_s17 = smov %s822_s19  ;;  %s1018_s18 = smov %s826_s20 }
 0x1cf   :  { %13 = sbr.rel (!%p11_p12) target bundleno = 4 (0x4), region = 117 }
 0x1d1   : > { %s1019_s19 = smov %s1013_s26 }
 0x1d2   : > { %s1020_s20 = smov %s1014_s11 }

</bundles_post_ra>
